<compile_context>
chip_gen: v6e
topology: v6e:2x2x1
jax: 0.10.0
libtpu: 0.0.40
codegen_flags: <defaults>
</compile_context>

<pallas_src>
import math

import jax
import jax.numpy as jnp
from jax.experimental import pallas as pl
from jax.experimental.pallas import tpu as pltpu


# --------------------------- one-time param prep -----------------------------


def _tile_gate_bias(b, n_nodes, width):
    """Gate bias (Co,) -> (1, width) row with value b[c] at index n*Co + c."""
    row = jnp.tile(b, n_nodes)
    return jnp.pad(row, (0, width - row.shape[0]))[None, :]


def prepare_params(params, a_hat):
    """Kron-expand and coalesce every parameter (plus A_hat) into a single
    bf16 blob of 128-wide rows, and return a static layout dict of python
    ints that the kernel closes over.

    Blob layout (all chunks 8-row aligned):
      per temporal conv:  [I_N ⊗ Wp[0..Kt-1], I_N ⊗ Wq[0..Kt-1]]
      per spatial block:  A_hatᵀ ⊗ Θ                              (128, 128)
      final FC:           M[(n*C+c), (to*N+n')] = fc_w[c,to]·I[n,n']  (128, 128)
      bias block:         one row per gate bias (tiled over nodes) + FC bias
    """
    N = a_hat.shape[0]
    eye_n = jnp.eye(N, dtype=jnp.float32)

    def split_conv(w, b):
        co = w.shape[2] // 2
        return w[:, :, :co], w[:, :, co:], b[0, :co], b[0, co:]

    convs, thetas = [], []
    for blk in ("block1", "block2"):
        p = params[blk]
        convs.append(split_conv(p["t1_w"], p["t1_b"]))
        thetas.append(p["theta"])
        convs.append(split_conv(p["t2_w"], p["t2_b"]))
    convs.append(split_conv(params["last_w"], params["last_b"]))

    width = N * convs[0][0].shape[2]          # N * C_out (= 128 here)

    chunks = []
    layout = {"width": width, "n_nodes": N}
    row = 0

    def add(mat):
        nonlocal row
        assert mat.shape[1] == width, mat.shape
        chunks.append(mat.astype(jnp.float32))
        off = row
        row += mat.shape[0]
        return off

    bias_rows = []
    b_row = 0
    # forward order: conv0, spat0, conv1 | conv2, spat1, conv3 | conv4 (last)
    order = [("conv", 0), ("spat", 0), ("conv", 1),
             ("conv", 2), ("spat", 1), ("conv", 3), ("conv", 4)]
    for kind, idx in order:
        if kind == "conv":
            wp, wq, bp, bq = convs[idx]
            kt, cin, _ = wp.shape
            mats = [jnp.kron(eye_n, wp[k]) for k in range(kt)]
            mats += [jnp.kron(eye_n, wq[k]) for k in range(kt)]
            off = add(jnp.concatenate(mats, axis=0))
            layout[f"conv{idx}"] = (off, N * cin, kt, b_row)
            bias_rows.append(_tile_gate_bias(bp, N, width))
            bias_rows.append(_tile_gate_bias(bq, N, width))
            b_row += 2
        else:
            theta = thetas[idx].astype(jnp.float32)
            off = add(jnp.kron(a_hat.T.astype(jnp.float32), theta))
            layout[f"spat{idx}"] = (off, N * theta.shape[0])

    # Final FC, emitted directly in (out_timesteps, nodes) row-major order.
    fc_w = params["fc_w"].astype(jnp.float32)            # (C, To)
    fc_b = params["fc_b"].reshape(-1).astype(jnp.float32)
    C, To = fc_w.shape
    m = jnp.einsum("nm,ct->nctm", eye_n, fc_w).reshape(N * C, To * N)
    layout["fc"] = (add(jnp.pad(m, ((0, 0), (0, width - To * N)))), N * C)
    bias_rows.append(jnp.pad(jnp.repeat(fc_b, N),
                             (0, width - To * N))[None, :])
    layout["fc_bias_row"] = b_row

    # Bias block at an 8-aligned offset, padded to a multiple of 8 rows.
    if row % 8:
        add(jnp.zeros((8 - row % 8, width), jnp.float32))
    biases = jnp.concatenate(bias_rows, axis=0)
    pad = (-biases.shape[0]) % 8
    biases = jnp.pad(biases, ((0, pad), (0, 0)))
    layout["bias"] = (add(biases), biases.shape[0])

    blob = jnp.concatenate(chunks, axis=0)
    if blob.shape[0] % 8:
        blob = jnp.pad(blob, ((0, 8 - blob.shape[0] % 8), (0, 0)))
    layout["total_rows"] = blob.shape[0]
    layout["out_cols"] = To * N
    # bf16 weights: MXU-native on v5e/v6e/v7x, halves the blob DMA bytes.
    return blob.astype(jnp.bfloat16), layout


# ------------------------------- fused kernel --------------------------------


def _build_kernel(layout):
    def kernel(x_ref, w_ref, o_ref):
        boff, brows = layout["bias"]
        biases = w_ref[boff:boff + brows, :].astype(jnp.float32)

        def bias_row(i):                       # (1, width) f32
            return biases[i:i + 1]

        def temporal(h, name):
            """Gated temporal conv (Conv2d (Kt,1) + GLU) in kron layout.
            h: (T, N*Cin) f32 -> (T-Kt+1, width) f32."""
            off, rows, kt, brow = layout[name]
            tout = h.shape[0] - kt + 1
            hb = h.astype(jnp.bfloat16)
            p = q = None
            for k in range(kt):                # Kt is static -> unrolled
                hk = hb[k:k + tout]            # shift along sublane axis only
                wp = w_ref[off + k * rows:off + (k + 1) * rows, :]
                wq = w_ref[off + (kt + k) * rows:off + (kt + k + 1) * rows, :]
                dp = jnp.dot(hk, wp, preferred_element_type=jnp.float32)
                dq = jnp.dot(hk, wq, preferred_element_type=jnp.float32)
                p = dp if k == 0 else p + dp   # assign on first tap
                q = dq if k == 0 else q + dq
            p = p + bias_row(brow)
            q = q + bias_row(brow + 1)
            return p * jax.nn.sigmoid(q)       # GLU gate, f32 VPU/EUP math

        def spatial(h, name):
            """ReLU( (A_hat @_nodes h) @ Theta ) as one kron GEMM.
            (The STConvBlock's outer ReLU is idempotent on top of this.)"""
            off, rows = layout[name]
            m = w_ref[off:off + rows, :]
            out = jnp.dot(h.astype(jnp.bfloat16), m,
                          preferred_element_type=jnp.float32)
            return jnp.maximum(out, 0.0)

        h = x_ref[0].astype(jnp.float32)       # (T, N*F)

        # ---- ST-Conv block 1 ----
        h = temporal(h, "conv0")
        h = spatial(h, "spat0")
        h = temporal(h, "conv1")
        # ---- ST-Conv block 2 ----
        h = temporal(h, "conv2")
        h = spatial(h, "spat1")
        h = temporal(h, "conv3")
        # ---- last temporal block (Tout == 1) ----
        h = temporal(h, "conv4")               # (1, width)

        # ---- final FC, emitted directly as (To, N) row-major in the lanes ----
        foff, frows = layout["fc"]
        y = jnp.dot(h.astype(jnp.bfloat16), w_ref[foff:foff + frows, :],
                    preferred_element_type=jnp.float32)
        y = y + bias_row(layout["fc_bias_row"])
        o_ref[0] = y.astype(o_ref.dtype)       # direct store, no concat

    return kernel


# ---------------------------- pallas_call wrapper -----------------------------


def make_stgcn_forward(layout):
    kernel = _build_kernel(layout)
    width = layout["width"]
    total_rows = layout["total_rows"]
    n_nodes = layout["n_nodes"]
    out_cols = layout["out_cols"]

    @jax.jit
    def forward(x, blob):
        B, T, N, F = x.shape
        x3 = x.reshape(B, T, N * F)            # row-major collapse, free
        out = pl.pallas_call(
            kernel,
            out_shape=jax.ShapeDtypeStruct((B, 1, width), x.dtype),
            grid=(B,),                         # per-batch grid step
            in_specs=[
                pl.BlockSpec((1, T, N * F), lambda b: (b, 0, 0)),
                pl.BlockSpec((total_rows, width), lambda b: (0, 0)),
            ],
            out_specs=pl.BlockSpec((1, 1, width), lambda b: (b, 0, 0)),
            compiler_params=pltpu.CompilerParams(
                dimension_semantics=("parallel",)),   # both TCs on v7x
        )(x3, blob)
        # Columns [out_cols:width] are exact zero padding; slice + row-major
        # reshape (no transpose) recovers (B, out_timesteps, N).
        return out[:, 0, :out_cols].reshape(B, out_cols // n_nodes, n_nodes)

    return forward


# ------------------------------ param handling --------------------------------


def conv_params(key, cin, cout, kt):
    """TemporalBlock conv: torch weight (2*cout, cin, kt, 1) stored as
    (kt, cin, 2*cout); uniform(-1/sqrt(fan_in), 1/sqrt(fan_in))."""
    kw, kb = jax.random.split(key)
    fan_in = cin * kt
    s = 1.0 / math.sqrt(fan_in)
    w = jax.random.uniform(kw, (kt, cin, 2 * cout), jnp.float32, -s, s)
    b = jax.random.uniform(kb, (1, 2 * cout), jnp.float32, -s, s)
    return w, b


def theta_params(key, cin, cout):
    s = 1.0 / math.sqrt(cout)
    return jax.random.uniform(key, (cin, cout), jnp.float32, -s, s)


def linear_params(key, cin, cout):
    kw, kb = jax.random.split(key)
    s = 1.0 / math.sqrt(cin)
    w = jax.random.uniform(kw, (cin, cout), jnp.float32, -s, s)
    b = jax.random.uniform(kb, (1, cout), jnp.float32, -s, s)
    return w, b


if __name__ == "__main__":
    # Small, consistent shapes.
    B, N = 2, 16
    num_features = 4
    in_timesteps = 12
    out_timesteps = 6
    spatial_in = 8
    spatial_out = 8
    temporal_out = 8
    Kt = 3
    Kt_last = in_timesteps - 4 * (Kt - 1)   # = 4

    root = jax.random.PRNGKey(0)
    keys = jax.random.split(root, 12)

    # Normalized adjacency A_hat = D^{-1/2} (W + I) D^{-1/2}
    W_adj = jax.random.uniform(keys[0], (N, N), jnp.float32)
    W_adj = 0.5 * (W_adj + W_adj.T) + jnp.eye(N, dtype=jnp.float32)
    d = jnp.sum(W_adj, axis=1)
    d_inv_sqrt = 1.0 / jnp.sqrt(d)
    A_hat = d_inv_sqrt[:, None] * W_adj * d_inv_sqrt[None, :]

    # Parameters (deterministic, shape-faithful to the PyTorch module).
    b1_t1_w, b1_t1_b = conv_params(keys[1], num_features, spatial_in, Kt)
    b1_theta = theta_params(keys[2], spatial_in, spatial_out)
    b1_t2_w, b1_t2_b = conv_params(keys[3], spatial_out, temporal_out, Kt)

    b2_t1_w, b2_t1_b = conv_params(keys[4], temporal_out, spatial_in, Kt)
    b2_theta = theta_params(keys[5], spatial_in, spatial_out)
    b2_t2_w, b2_t2_b = conv_params(keys[6], spatial_out, temporal_out, Kt)

    last_w, last_b = conv_params(keys[7], temporal_out, temporal_out, Kt_last)
    fc_w, fc_b = linear_params(keys[8], temporal_out, out_timesteps)

    params = {
        'block1': {'t1_w': b1_t1_w, 't1_b': b1_t1_b, 'theta': b1_theta,
                   't2_w': b1_t2_w, 't2_b': b1_t2_b},
        'block2': {'t1_w': b2_t1_w, 't1_b': b2_t1_b, 'theta': b2_theta,
                   't2_w': b2_t2_w, 't2_b': b2_t2_b},
        'last_w': last_w, 'last_b': last_b,
        'fc_w': fc_w, 'fc_b': fc_b,
    }

    # One-time (outside jit) kron expansion + blob packing.
    blob, layout = prepare_params(params, A_hat)
    fwd = make_stgcn_forward(layout)

    # Input: (batch, time, nodes, features)
    x = jax.random.normal(keys[9], (B, in_timesteps, N, num_features),
                          jnp.float32)

    out = fwd(x, blob)
    jax.block_until_ready(out)

    assert out.shape == (B, out_timesteps, N), out.shape
    assert bool(jnp.all(jnp.isfinite(out)))
    print("KERNEL_OK")
</pallas_src>

<mosaic_0001>
module attributes {stable_mosaic.version = 11 : i64} {
  func.func @kernel(%arg0: i32, %arg1: memref<1x12x64xf32, #tpu.memory_space<vmem>>, %arg2: memref<4112x128xbf16, #tpu.memory_space<vmem>>, %arg3: memref<1x1x128xf32, #tpu.memory_space<vmem>>) attributes {dimension_semantics = [#tpu.dimension_semantics<parallel>], iteration_bounds = array<i64: 2>, scalar_prefetch = 0 : i64, scratch_operands = 0 : i64, tpu.core_type = #tpu.core_type<tc>, window_params = [{transform_indices = @transform_0, window_bounds = array<i64: 1, 12, 64>}, {pipeline_mode = #tpu.pipeline_mode<synchronous>, transform_indices = @transform_1, window_bounds = array<i64: 4112, 128>}, {transform_indices = @transform_2, window_bounds = array<i64: 1, 1, 128>}]} {
    %c4096 = arith.constant 4096 : index
    %c0 = arith.constant 0 : index
    %0 = vector.load %arg2[%c4096, %c0] : memref<4112x128xbf16, #tpu.memory_space<vmem>>, vector<16x128xbf16>
    %1 = arith.extf %0 : vector<16x128xbf16> to vector<16x128xf32>
    %c0_0 = arith.constant 0 : index
    %c0_1 = arith.constant 0 : index
    %c0_2 = arith.constant 0 : index
    %2 = vector.load %arg1[%c0_0, %c0_1, %c0_2] : memref<1x12x64xf32, #tpu.memory_space<vmem>>, vector<1x12x64xf32>
    %3 = vector.shape_cast %2 : vector<1x12x64xf32> to vector<12x64xf32>
    %4 = arith.truncf %3 : vector<12x64xf32> to vector<12x64xbf16>
    %5 = vector.extract_strided_slice %4 {offsets = [0, 0], sizes = [10, 64], strides = [1, 1]} : vector<12x64xbf16> to vector<10x64xbf16>
    %c0_3 = arith.constant 0 : index
    %c0_4 = arith.constant 0 : index
    %6 = vector.load %arg2[%c0_3, %c0_4] : memref<4112x128xbf16, #tpu.memory_space<vmem>>, vector<64x128xbf16>
    %c192 = arith.constant 192 : index
    %c0_5 = arith.constant 0 : index
    %7 = vector.load %arg2[%c192, %c0_5] : memref<4112x128xbf16, #tpu.memory_space<vmem>>, vector<64x128xbf16>
    %cst = arith.constant dense<0.000000e+00> : vector<10x128xf32>
    %8 = tpu.matmul %5, %6, %cst {dimension_numbers = #tpu.dot_dimension_numbers<[1], [0], [0], [1], [0, 0, 1, 1], [], []>} : vector<10x64xbf16>, vector<64x128xbf16>, vector<10x128xf32> -> vector<10x128xf32>
    %cst_6 = arith.constant dense<0.000000e+00> : vector<10x128xf32>
    %9 = tpu.matmul %5, %7, %cst_6 {dimension_numbers = #tpu.dot_dimension_numbers<[1], [0], [0], [1], [0, 0, 1, 1], [], []>} : vector<10x64xbf16>, vector<64x128xbf16>, vector<10x128xf32> -> vector<10x128xf32>
    %10 = vector.extract_strided_slice %4 {offsets = [1, 0], sizes = [10, 64], strides = [1, 1]} : vector<12x64xbf16> to vector<10x64xbf16>
    %c64 = arith.constant 64 : index
    %c0_7 = arith.constant 0 : index
    %11 = vector.load %arg2[%c64, %c0_7] : memref<4112x128xbf16, #tpu.memory_space<vmem>>, vector<64x128xbf16>
    %c256 = arith.constant 256 : index
    %c0_8 = arith.constant 0 : index
    %12 = vector.load %arg2[%c256, %c0_8] : memref<4112x128xbf16, #tpu.memory_space<vmem>>, vector<64x128xbf16>
    %cst_9 = arith.constant dense<0.000000e+00> : vector<10x128xf32>
    %13 = tpu.matmul %10, %11, %cst_9 {dimension_numbers = #tpu.dot_dimension_numbers<[1], [0], [0], [1], [0, 0, 1, 1], [], []>} : vector<10x64xbf16>, vector<64x128xbf16>, vector<10x128xf32> -> vector<10x128xf32>
    %cst_10 = arith.constant dense<0.000000e+00> : vector<10x128xf32>
    %14 = tpu.matmul %10, %12, %cst_10 {dimension_numbers = #tpu.dot_dimension_numbers<[1], [0], [0], [1], [0, 0, 1, 1], [], []>} : vector<10x64xbf16>, vector<64x128xbf16>, vector<10x128xf32> -> vector<10x128xf32>
    %15 = arith.addf %8, %13 : vector<10x128xf32>
    %16 = arith.addf %9, %14 : vector<10x128xf32>
    %17 = vector.extract_strided_slice %4 {offsets = [2, 0], sizes = [10, 64], strides = [1, 1]} : vector<12x64xbf16> to vector<10x64xbf16>
    %c128 = arith.constant 128 : index
    %c0_11 = arith.constant 0 : index
    %18 = vector.load %arg2[%c128, %c0_11] : memref<4112x128xbf16, #tpu.memory_space<vmem>>, vector<64x128xbf16>
    %c320 = arith.constant 320 : index
    %c0_12 = arith.constant 0 : index
    %19 = vector.load %arg2[%c320, %c0_12] : memref<4112x128xbf16, #tpu.memory_space<vmem>>, vector<64x128xbf16>
    %cst_13 = arith.constant dense<0.000000e+00> : vector<10x128xf32>
    %20 = tpu.matmul %17, %18, %cst_13 {dimension_numbers = #tpu.dot_dimension_numbers<[1], [0], [0], [1], [0, 0, 1, 1], [], []>} : vector<10x64xbf16>, vector<64x128xbf16>, vector<10x128xf32> -> vector<10x128xf32>
    %cst_14 = arith.constant dense<0.000000e+00> : vector<10x128xf32>
    %21 = tpu.matmul %17, %19, %cst_14 {dimension_numbers = #tpu.dot_dimension_numbers<[1], [0], [0], [1], [0, 0, 1, 1], [], []>} : vector<10x64xbf16>, vector<64x128xbf16>, vector<10x128xf32> -> vector<10x128xf32>
    %22 = arith.addf %15, %20 : vector<10x128xf32>
    %23 = arith.addf %16, %21 : vector<10x128xf32>
    %24 = vector.extract_strided_slice %1 {offsets = [0, 0], sizes = [1, 128], strides = [1, 1]} : vector<16x128xf32> to vector<1x128xf32>
    %25 = vector.broadcast %24 : vector<1x128xf32> to vector<10x128xf32>
    %26 = arith.addf %22, %25 : vector<10x128xf32>
    %27 = vector.extract_strided_slice %1 {offsets = [1, 0], sizes = [1, 128], strides = [1, 1]} : vector<16x128xf32> to vector<1x128xf32>
    %28 = vector.broadcast %27 : vector<1x128xf32> to vector<10x128xf32>
    %29 = arith.addf %23, %28 : vector<10x128xf32>
    %30 = arith.negf %29 : vector<10x128xf32>
    %31 = math.exp %30 : vector<10x128xf32>
    %cst_15 = arith.constant 1.000000e+00 : f32
    %32 = vector.broadcast %cst_15 : f32 to vector<10x128xf32>
    %33 = arith.addf %32, %31 : vector<10x128xf32>
    %34 = arith.divf %32, %33 : vector<10x128xf32>
    %35 = arith.mulf %26, %34 : vector<10x128xf32>
    %c384 = arith.constant 384 : index
    %c0_16 = arith.constant 0 : index
    %36 = vector.load %arg2[%c384, %c0_16] : memref<4112x128xbf16, #tpu.memory_space<vmem>>, vector<128x128xbf16>
    %37 = arith.truncf %35 : vector<10x128xf32> to vector<10x128xbf16>
    %cst_17 = arith.constant dense<0.000000e+00> : vector<10x128xf32>
    %38 = tpu.matmul %37, %36, %cst_17 {dimension_numbers = #tpu.dot_dimension_numbers<[1], [0], [0], [1], [0, 0, 1, 1], [], []>} : vector<10x128xbf16>, vector<128x128xbf16>, vector<10x128xf32> -> vector<10x128xf32>
    %cst_18 = arith.constant 0.000000e+00 : f32
    %39 = vector.broadcast %cst_18 : f32 to vector<10x128xf32>
    %40 = arith.maximumf %38, %39 : vector<10x128xf32>
    %41 = arith.truncf %40 : vector<10x128xf32> to vector<10x128xbf16>
    %42 = vector.extract_strided_slice %41 {offsets = [0, 0], sizes = [8, 128], strides = [1, 1]} : vector<10x128xbf16> to vector<8x128xbf16>
    %c512 = arith.constant 512 : index
    %c0_19 = arith.constant 0 : index
    %43 = vector.load %arg2[%c512, %c0_19] : memref<4112x128xbf16, #tpu.memory_space<vmem>>, vector<128x128xbf16>
    %c896 = arith.constant 896 : index
    %c0_20 = arith.constant 0 : index
    %44 = vector.load %arg2[%c896, %c0_20] : memref<4112x128xbf16, #tpu.memory_space<vmem>>, vector<128x128xbf16>
    %cst_21 = arith.constant dense<0.000000e+00> : vector<8x128xf32>
    %45 = tpu.matmul %42, %43, %cst_21 {dimension_numbers = #tpu.dot_dimension_numbers<[1], [0], [0], [1], [0, 0, 1, 1], [], []>} : vector<8x128xbf16>, vector<128x128xbf16>, vector<8x128xf32> -> vector<8x128xf32>
    %cst_22 = arith.constant dense<0.000000e+00> : vector<8x128xf32>
    %46 = tpu.matmul %42, %44, %cst_22 {dimension_numbers = #tpu.dot_dimension_numbers<[1], [0], [0], [1], [0, 0, 1, 1], [], []>} : vector<8x128xbf16>, vector<128x128xbf16>, vector<8x128xf32> -> vector<8x128xf32>
    %47 = vector.extract_strided_slice %41 {offsets = [1, 0], sizes = [8, 128], strides = [1, 1]} : vector<10x128xbf16> to vector<8x128xbf16>
    %c640 = arith.constant 640 : index
    %c0_23 = arith.constant 0 : index
    %48 = vector.load %arg2[%c640, %c0_23] : memref<4112x128xbf16, #tpu.memory_space<vmem>>, vector<128x128xbf16>
    %c1024 = arith.constant 1024 : index
    %c0_24 = arith.constant 0 : index
    %49 = vector.load %arg2[%c1024, %c0_24] : memref<4112x128xbf16, #tpu.memory_space<vmem>>, vector<128x128xbf16>
    %cst_25 = arith.constant dense<0.000000e+00> : vector<8x128xf32>
    %50 = tpu.matmul %47, %48, %cst_25 {dimension_numbers = #tpu.dot_dimension_numbers<[1], [0], [0], [1], [0, 0, 1, 1], [], []>} : vector<8x128xbf16>, vector<128x128xbf16>, vector<8x128xf32> -> vector<8x128xf32>
    %cst_26 = arith.constant dense<0.000000e+00> : vector<8x128xf32>
    %51 = tpu.matmul %47, %49, %cst_26 {dimension_numbers = #tpu.dot_dimension_numbers<[1], [0], [0], [1], [0, 0, 1, 1], [], []>} : vector<8x128xbf16>, vector<128x128xbf16>, vector<8x128xf32> -> vector<8x128xf32>
    %52 = arith.addf %45, %50 : vector<8x128xf32>
    %53 = arith.addf %46, %51 : vector<8x128xf32>
    %54 = vector.extract_strided_slice %41 {offsets = [2, 0], sizes = [8, 128], strides = [1, 1]} : vector<10x128xbf16> to vector<8x128xbf16>
    %c768 = arith.constant 768 : index
    %c0_27 = arith.constant 0 : index
    %55 = vector.load %arg2[%c768, %c0_27] : memref<4112x128xbf16, #tpu.memory_space<vmem>>, vector<128x128xbf16>
    %c1152 = arith.constant 1152 : index
    %c0_28 = arith.constant 0 : index
    %56 = vector.load %arg2[%c1152, %c0_28] : memref<4112x128xbf16, #tpu.memory_space<vmem>>, vector<128x128xbf16>
    %cst_29 = arith.constant dense<0.000000e+00> : vector<8x128xf32>
    %57 = tpu.matmul %54, %55, %cst_29 {dimension_numbers = #tpu.dot_dimension_numbers<[1], [0], [0], [1], [0, 0, 1, 1], [], []>} : vector<8x128xbf16>, vector<128x128xbf16>, vector<8x128xf32> -> vector<8x128xf32>
    %cst_30 = arith.constant dense<0.000000e+00> : vector<8x128xf32>
    %58 = tpu.matmul %54, %56, %cst_30 {dimension_numbers = #tpu.dot_dimension_numbers<[1], [0], [0], [1], [0, 0, 1, 1], [], []>} : vector<8x128xbf16>, vector<128x128xbf16>, vector<8x128xf32> -> vector<8x128xf32>
    %59 = arith.addf %52, %57 : vector<8x128xf32>
    %60 = arith.addf %53, %58 : vector<8x128xf32>
    %61 = vector.extract_strided_slice %1 {offsets = [2, 0], sizes = [1, 128], strides = [1, 1]} : vector<16x128xf32> to vector<1x128xf32>
    %62 = vector.broadcast %61 : vector<1x128xf32> to vector<8x128xf32>
    %63 = arith.addf %59, %62 : vector<8x128xf32>
    %64 = vector.extract_strided_slice %1 {offsets = [3, 0], sizes = [1, 128], strides = [1, 1]} : vector<16x128xf32> to vector<1x128xf32>
    %65 = vector.broadcast %64 : vector<1x128xf32> to vector<8x128xf32>
    %66 = arith.addf %60, %65 : vector<8x128xf32>
    %67 = arith.negf %66 : vector<8x128xf32>
    %68 = math.exp %67 : vector<8x128xf32>
    %cst_31 = arith.constant 1.000000e+00 : f32
    %69 = vector.broadcast %cst_31 : f32 to vector<8x128xf32>
    %70 = arith.addf %69, %68 : vector<8x128xf32>
    %71 = arith.divf %69, %70 : vector<8x128xf32>
    %72 = arith.mulf %63, %71 : vector<8x128xf32>
    %73 = arith.truncf %72 : vector<8x128xf32> to vector<8x128xbf16>
    %74 = vector.extract_strided_slice %73 {offsets = [0, 0], sizes = [6, 128], strides = [1, 1]} : vector<8x128xbf16> to vector<6x128xbf16>
    %c1280 = arith.constant 1280 : index
    %c0_32 = arith.constant 0 : index
    %75 = vector.load %arg2[%c1280, %c0_32] : memref<4112x128xbf16, #tpu.memory_space<vmem>>, vector<128x128xbf16>
    %c1664 = arith.constant 1664 : index
    %c0_33 = arith.constant 0 : index
    %76 = vector.load %arg2[%c1664, %c0_33] : memref<4112x128xbf16, #tpu.memory_space<vmem>>, vector<128x128xbf16>
    %cst_34 = arith.constant dense<0.000000e+00> : vector<6x128xf32>
    %77 = tpu.matmul %74, %75, %cst_34 {dimension_numbers = #tpu.dot_dimension_numbers<[1], [0], [0], [1], [0, 0, 1, 1], [], []>} : vector<6x128xbf16>, vector<128x128xbf16>, vector<6x128xf32> -> vector<6x128xf32>
    %cst_35 = arith.constant dense<0.000000e+00> : vector<6x128xf32>
    %78 = tpu.matmul %74, %76, %cst_35 {dimension_numbers = #tpu.dot_dimension_numbers<[1], [0], [0], [1], [0, 0, 1, 1], [], []>} : vector<6x128xbf16>, vector<128x128xbf16>, vector<6x128xf32> -> vector<6x128xf32>
    %79 = vector.extract_strided_slice %73 {offsets = [1, 0], sizes = [6, 128], strides = [1, 1]} : vector<8x128xbf16> to vector<6x128xbf16>
    %c1408 = arith.constant 1408 : index
    %c0_36 = arith.constant 0 : index
    %80 = vector.load %arg2[%c1408, %c0_36] : memref<4112x128xbf16, #tpu.memory_space<vmem>>, vector<128x128xbf16>
    %c1792 = arith.constant 1792 : index
    %c0_37 = arith.constant 0 : index
    %81 = vector.load %arg2[%c1792, %c0_37] : memref<4112x128xbf16, #tpu.memory_space<vmem>>, vector<128x128xbf16>
    %cst_38 = arith.constant dense<0.000000e+00> : vector<6x128xf32>
    %82 = tpu.matmul %79, %80, %cst_38 {dimension_numbers = #tpu.dot_dimension_numbers<[1], [0], [0], [1], [0, 0, 1, 1], [], []>} : vector<6x128xbf16>, vector<128x128xbf16>, vector<6x128xf32> -> vector<6x128xf32>
    %cst_39 = arith.constant dense<0.000000e+00> : vector<6x128xf32>
    %83 = tpu.matmul %79, %81, %cst_39 {dimension_numbers = #tpu.dot_dimension_numbers<[1], [0], [0], [1], [0, 0, 1, 1], [], []>} : vector<6x128xbf16>, vector<128x128xbf16>, vector<6x128xf32> -> vector<6x128xf32>
    %84 = arith.addf %77, %82 : vector<6x128xf32>
    %85 = arith.addf %78, %83 : vector<6x128xf32>
    %86 = vector.extract_strided_slice %73 {offsets = [2, 0], sizes = [6, 128], strides = [1, 1]} : vector<8x128xbf16> to vector<6x128xbf16>
    %c1536 = arith.constant 1536 : index
    %c0_40 = arith.constant 0 : index
    %87 = vector.load %arg2[%c1536, %c0_40] : memref<4112x128xbf16, #tpu.memory_space<vmem>>, vector<128x128xbf16>
    %c1920 = arith.constant 1920 : index
    %c0_41 = arith.constant 0 : index
    %88 = vector.load %arg2[%c1920, %c0_41] : memref<4112x128xbf16, #tpu.memory_space<vmem>>, vector<128x128xbf16>
    %cst_42 = arith.constant dense<0.000000e+00> : vector<6x128xf32>
    %89 = tpu.matmul %86, %87, %cst_42 {dimension_numbers = #tpu.dot_dimension_numbers<[1], [0], [0], [1], [0, 0, 1, 1], [], []>} : vector<6x128xbf16>, vector<128x128xbf16>, vector<6x128xf32> -> vector<6x128xf32>
    %cst_43 = arith.constant dense<0.000000e+00> : vector<6x128xf32>
    %90 = tpu.matmul %86, %88, %cst_43 {dimension_numbers = #tpu.dot_dimension_numbers<[1], [0], [0], [1], [0, 0, 1, 1], [], []>} : vector<6x128xbf16>, vector<128x128xbf16>, vector<6x128xf32> -> vector<6x128xf32>
    %91 = arith.addf %84, %89 : vector<6x128xf32>
    %92 = arith.addf %85, %90 : vector<6x128xf32>
    %93 = vector.extract_strided_slice %1 {offsets = [4, 0], sizes = [1, 128], strides = [1, 1]} : vector<16x128xf32> to vector<1x128xf32>
    %94 = vector.broadcast %93 : vector<1x128xf32> to vector<6x128xf32>
    %95 = arith.addf %91, %94 : vector<6x128xf32>
    %96 = vector.extract_strided_slice %1 {offsets = [5, 0], sizes = [1, 128], strides = [1, 1]} : vector<16x128xf32> to vector<1x128xf32>
    %97 = vector.broadcast %96 : vector<1x128xf32> to vector<6x128xf32>
    %98 = arith.addf %92, %97 : vector<6x128xf32>
    %99 = arith.negf %98 : vector<6x128xf32>
    %100 = math.exp %99 : vector<6x128xf32>
    %cst_44 = arith.constant 1.000000e+00 : f32
    %101 = vector.broadcast %cst_44 : f32 to vector<6x128xf32>
    %102 = arith.addf %101, %100 : vector<6x128xf32>
    %103 = arith.divf %101, %102 : vector<6x128xf32>
    %104 = arith.mulf %95, %103 : vector<6x128xf32>
    %c2048 = arith.constant 2048 : index
    %c0_45 = arith.constant 0 : index
    %105 = vector.load %arg2[%c2048, %c0_45] : memref<4112x128xbf16, #tpu.memory_space<vmem>>, vector<128x128xbf16>
    %106 = arith.truncf %104 : vector<6x128xf32> to vector<6x128xbf16>
    %cst_46 = arith.constant dense<0.000000e+00> : vector<6x128xf32>
    %107 = tpu.matmul %106, %105, %cst_46 {dimension_numbers = #tpu.dot_dimension_numbers<[1], [0], [0], [1], [0, 0, 1, 1], [], []>} : vector<6x128xbf16>, vector<128x128xbf16>, vector<6x128xf32> -> vector<6x128xf32>
    %cst_47 = arith.constant 0.000000e+00 : f32
    %108 = vector.broadcast %cst_47 : f32 to vector<6x128xf32>
    %109 = arith.maximumf %107, %108 : vector<6x128xf32>
    %110 = arith.truncf %109 : vector<6x128xf32> to vector<6x128xbf16>
    %111 = vector.extract_strided_slice %110 {offsets = [0, 0], sizes = [4, 128], strides = [1, 1]} : vector<6x128xbf16> to vector<4x128xbf16>
    %c2176 = arith.constant 2176 : index
    %c0_48 = arith.constant 0 : index
    %112 = vector.load %arg2[%c2176, %c0_48] : memref<4112x128xbf16, #tpu.memory_space<vmem>>, vector<128x128xbf16>
    %c2560 = arith.constant 2560 : index
    %c0_49 = arith.constant 0 : index
    %113 = vector.load %arg2[%c2560, %c0_49] : memref<4112x128xbf16, #tpu.memory_space<vmem>>, vector<128x128xbf16>
    %cst_50 = arith.constant dense<0.000000e+00> : vector<4x128xf32>
    %114 = tpu.matmul %111, %112, %cst_50 {dimension_numbers = #tpu.dot_dimension_numbers<[1], [0], [0], [1], [0, 0, 1, 1], [], []>} : vector<4x128xbf16>, vector<128x128xbf16>, vector<4x128xf32> -> vector<4x128xf32>
    %cst_51 = arith.constant dense<0.000000e+00> : vector<4x128xf32>
    %115 = tpu.matmul %111, %113, %cst_51 {dimension_numbers = #tpu.dot_dimension_numbers<[1], [0], [0], [1], [0, 0, 1, 1], [], []>} : vector<4x128xbf16>, vector<128x128xbf16>, vector<4x128xf32> -> vector<4x128xf32>
    %116 = vector.extract_strided_slice %110 {offsets = [1, 0], sizes = [4, 128], strides = [1, 1]} : vector<6x128xbf16> to vector<4x128xbf16>
    %c2304 = arith.constant 2304 : index
    %c0_52 = arith.constant 0 : index
    %117 = vector.load %arg2[%c2304, %c0_52] : memref<4112x128xbf16, #tpu.memory_space<vmem>>, vector<128x128xbf16>
    %c2688 = arith.constant 2688 : index
    %c0_53 = arith.constant 0 : index
    %118 = vector.load %arg2[%c2688, %c0_53] : memref<4112x128xbf16, #tpu.memory_space<vmem>>, vector<128x128xbf16>
    %cst_54 = arith.constant dense<0.000000e+00> : vector<4x128xf32>
    %119 = tpu.matmul %116, %117, %cst_54 {dimension_numbers = #tpu.dot_dimension_numbers<[1], [0], [0], [1], [0, 0, 1, 1], [], []>} : vector<4x128xbf16>, vector<128x128xbf16>, vector<4x128xf32> -> vector<4x128xf32>
    %cst_55 = arith.constant dense<0.000000e+00> : vector<4x128xf32>
    %120 = tpu.matmul %116, %118, %cst_55 {dimension_numbers = #tpu.dot_dimension_numbers<[1], [0], [0], [1], [0, 0, 1, 1], [], []>} : vector<4x128xbf16>, vector<128x128xbf16>, vector<4x128xf32> -> vector<4x128xf32>
    %121 = arith.addf %114, %119 : vector<4x128xf32>
    %122 = arith.addf %115, %120 : vector<4x128xf32>
    %123 = vector.extract_strided_slice %110 {offsets = [2, 0], sizes = [4, 128], strides = [1, 1]} : vector<6x128xbf16> to vector<4x128xbf16>
    %c2432 = arith.constant 2432 : index
    %c0_56 = arith.constant 0 : index
    %124 = vector.load %arg2[%c2432, %c0_56] : memref<4112x128xbf16, #tpu.memory_space<vmem>>, vector<128x128xbf16>
    %c2816 = arith.constant 2816 : index
    %c0_57 = arith.constant 0 : index
    %125 = vector.load %arg2[%c2816, %c0_57] : memref<4112x128xbf16, #tpu.memory_space<vmem>>, vector<128x128xbf16>
    %cst_58 = arith.constant dense<0.000000e+00> : vector<4x128xf32>
    %126 = tpu.matmul %123, %124, %cst_58 {dimension_numbers = #tpu.dot_dimension_numbers<[1], [0], [0], [1], [0, 0, 1, 1], [], []>} : vector<4x128xbf16>, vector<128x128xbf16>, vector<4x128xf32> -> vector<4x128xf32>
    %cst_59 = arith.constant dense<0.000000e+00> : vector<4x128xf32>
    %127 = tpu.matmul %123, %125, %cst_59 {dimension_numbers = #tpu.dot_dimension_numbers<[1], [0], [0], [1], [0, 0, 1, 1], [], []>} : vector<4x128xbf16>, vector<128x128xbf16>, vector<4x128xf32> -> vector<4x128xf32>
    %128 = arith.addf %121, %126 : vector<4x128xf32>
    %129 = arith.addf %122, %127 : vector<4x128xf32>
    %130 = vector.extract_strided_slice %1 {offsets = [6, 0], sizes = [1, 128], strides = [1, 1]} : vector<16x128xf32> to vector<1x128xf32>
    %131 = vector.broadcast %130 : vector<1x128xf32> to vector<4x128xf32>
    %132 = arith.addf %128, %131 : vector<4x128xf32>
    %133 = vector.extract_strided_slice %1 {offsets = [7, 0], sizes = [1, 128], strides = [1, 1]} : vector<16x128xf32> to vector<1x128xf32>
    %134 = vector.broadcast %133 : vector<1x128xf32> to vector<4x128xf32>
    %135 = arith.addf %129, %134 : vector<4x128xf32>
    %136 = arith.negf %135 : vector<4x128xf32>
    %137 = math.exp %136 : vector<4x128xf32>
    %cst_60 = arith.constant 1.000000e+00 : f32
    %138 = vector.broadcast %cst_60 : f32 to vector<4x128xf32>
    %139 = arith.addf %138, %137 : vector<4x128xf32>
    %140 = arith.divf %138, %139 : vector<4x128xf32>
    %141 = arith.mulf %132, %140 : vector<4x128xf32>
    %142 = arith.truncf %141 : vector<4x128xf32> to vector<4x128xbf16>
    %143 = vector.extract_strided_slice %142 {offsets = [0, 0], sizes = [1, 128], strides = [1, 1]} : vector<4x128xbf16> to vector<1x128xbf16>
    %c2944 = arith.constant 2944 : index
    %c0_61 = arith.constant 0 : index
    %144 = vector.load %arg2[%c2944, %c0_61] : memref<4112x128xbf16, #tpu.memory_space<vmem>>, vector<128x128xbf16>
    %c3456 = arith.constant 3456 : index
    %c0_62 = arith.constant 0 : index
    %145 = vector.load %arg2[%c3456, %c0_62] : memref<4112x128xbf16, #tpu.memory_space<vmem>>, vector<128x128xbf16>
    %cst_63 = arith.constant dense<0.000000e+00> : vector<1x128xf32>
    %146 = tpu.matmul %143, %144, %cst_63 {dimension_numbers = #tpu.dot_dimension_numbers<[1], [0], [0], [1], [0, 0, 1, 1], [], []>} : vector<1x128xbf16>, vector<128x128xbf16>, vector<1x128xf32> -> vector<1x128xf32>
    %cst_64 = arith.constant dense<0.000000e+00> : vector<1x128xf32>
    %147 = tpu.matmul %143, %145, %cst_64 {dimension_numbers = #tpu.dot_dimension_numbers<[1], [0], [0], [1], [0, 0, 1, 1], [], []>} : vector<1x128xbf16>, vector<128x128xbf16>, vector<1x128xf32> -> vector<1x128xf32>
    %148 = vector.extract_strided_slice %142 {offsets = [1, 0], sizes = [1, 128], strides = [1, 1]} : vector<4x128xbf16> to vector<1x128xbf16>
    %c3072 = arith.constant 3072 : index
    %c0_65 = arith.constant 0 : index
    %149 = vector.load %arg2[%c3072, %c0_65] : memref<4112x128xbf16, #tpu.memory_space<vmem>>, vector<128x128xbf16>
    %c3584 = arith.constant 3584 : index
    %c0_66 = arith.constant 0 : index
    %150 = vector.load %arg2[%c3584, %c0_66] : memref<4112x128xbf16, #tpu.memory_space<vmem>>, vector<128x128xbf16>
    %cst_67 = arith.constant dense<0.000000e+00> : vector<1x128xf32>
    %151 = tpu.matmul %148, %149, %cst_67 {dimension_numbers = #tpu.dot_dimension_numbers<[1], [0], [0], [1], [0, 0, 1, 1], [], []>} : vector<1x128xbf16>, vector<128x128xbf16>, vector<1x128xf32> -> vector<1x128xf32>
    %cst_68 = arith.constant dense<0.000000e+00> : vector<1x128xf32>
    %152 = tpu.matmul %148, %150, %cst_68 {dimension_numbers = #tpu.dot_dimension_numbers<[1], [0], [0], [1], [0, 0, 1, 1], [], []>} : vector<1x128xbf16>, vector<128x128xbf16>, vector<1x128xf32> -> vector<1x128xf32>
    %153 = arith.addf %146, %151 : vector<1x128xf32>
    %154 = arith.addf %147, %152 : vector<1x128xf32>
    %155 = vector.extract_strided_slice %142 {offsets = [2, 0], sizes = [1, 128], strides = [1, 1]} : vector<4x128xbf16> to vector<1x128xbf16>
    %c3200 = arith.constant 3200 : index
    %c0_69 = arith.constant 0 : index
    %156 = vector.load %arg2[%c3200, %c0_69] : memref<4112x128xbf16, #tpu.memory_space<vmem>>, vector<128x128xbf16>
    %c3712 = arith.constant 3712 : index
    %c0_70 = arith.constant 0 : index
    %157 = vector.load %arg2[%c3712, %c0_70] : memref<4112x128xbf16, #tpu.memory_space<vmem>>, vector<128x128xbf16>
    %cst_71 = arith.constant dense<0.000000e+00> : vector<1x128xf32>
    %158 = tpu.matmul %155, %156, %cst_71 {dimension_numbers = #tpu.dot_dimension_numbers<[1], [0], [0], [1], [0, 0, 1, 1], [], []>} : vector<1x128xbf16>, vector<128x128xbf16>, vector<1x128xf32> -> vector<1x128xf32>
    %cst_72 = arith.constant dense<0.000000e+00> : vector<1x128xf32>
    %159 = tpu.matmul %155, %157, %cst_72 {dimension_numbers = #tpu.dot_dimension_numbers<[1], [0], [0], [1], [0, 0, 1, 1], [], []>} : vector<1x128xbf16>, vector<128x128xbf16>, vector<1x128xf32> -> vector<1x128xf32>
    %160 = arith.addf %153, %158 : vector<1x128xf32>
    %161 = arith.addf %154, %159 : vector<1x128xf32>
    %162 = vector.extract_strided_slice %142 {offsets = [3, 0], sizes = [1, 128], strides = [1, 1]} : vector<4x128xbf16> to vector<1x128xbf16>
    %c3328 = arith.constant 3328 : index
    %c0_73 = arith.constant 0 : index
    %163 = vector.load %arg2[%c3328, %c0_73] : memref<4112x128xbf16, #tpu.memory_space<vmem>>, vector<128x128xbf16>
    %c3840 = arith.constant 3840 : index
    %c0_74 = arith.constant 0 : index
    %164 = vector.load %arg2[%c3840, %c0_74] : memref<4112x128xbf16, #tpu.memory_space<vmem>>, vector<128x128xbf16>
    %cst_75 = arith.constant dense<0.000000e+00> : vector<1x128xf32>
    %165 = tpu.matmul %162, %163, %cst_75 {dimension_numbers = #tpu.dot_dimension_numbers<[1], [0], [0], [1], [0, 0, 1, 1], [], []>} : vector<1x128xbf16>, vector<128x128xbf16>, vector<1x128xf32> -> vector<1x128xf32>
    %cst_76 = arith.constant dense<0.000000e+00> : vector<1x128xf32>
    %166 = tpu.matmul %162, %164, %cst_76 {dimension_numbers = #tpu.dot_dimension_numbers<[1], [0], [0], [1], [0, 0, 1, 1], [], []>} : vector<1x128xbf16>, vector<128x128xbf16>, vector<1x128xf32> -> vector<1x128xf32>
    %167 = arith.addf %160, %165 : vector<1x128xf32>
    %168 = arith.addf %161, %166 : vector<1x128xf32>
    %169 = vector.extract_strided_slice %1 {offsets = [8, 0], sizes = [1, 128], strides = [1, 1]} : vector<16x128xf32> to vector<1x128xf32>
    %170 = arith.addf %167, %169 : vector<1x128xf32>
    %171 = vector.extract_strided_slice %1 {offsets = [9, 0], sizes = [1, 128], strides = [1, 1]} : vector<16x128xf32> to vector<1x128xf32>
    %172 = arith.addf %168, %171 : vector<1x128xf32>
    %173 = arith.negf %172 : vector<1x128xf32>
    %174 = math.exp %173 : vector<1x128xf32>
    %cst_77 = arith.constant 1.000000e+00 : f32
    %175 = vector.broadcast %cst_77 : f32 to vector<1x128xf32>
    %176 = arith.addf %175, %174 : vector<1x128xf32>
    %177 = arith.divf %175, %176 : vector<1x128xf32>
    %178 = arith.mulf %170, %177 : vector<1x128xf32>
    %179 = arith.truncf %178 : vector<1x128xf32> to vector<1x128xbf16>
    %c3968 = arith.constant 3968 : index
    %c0_78 = arith.constant 0 : index
    %180 = vector.load %arg2[%c3968, %c0_78] : memref<4112x128xbf16, #tpu.memory_space<vmem>>, vector<128x128xbf16>
    %cst_79 = arith.constant dense<0.000000e+00> : vector<1x128xf32>
    %181 = tpu.matmul %179, %180, %cst_79 {dimension_numbers = #tpu.dot_dimension_numbers<[1], [0], [0], [1], [0, 0, 1, 1], [], []>} : vector<1x128xbf16>, vector<128x128xbf16>, vector<1x128xf32> -> vector<1x128xf32>
    %182 = vector.extract_strided_slice %1 {offsets = [10, 0], sizes = [1, 128], strides = [1, 1]} : vector<16x128xf32> to vector<1x128xf32>
    %183 = arith.addf %181, %182 : vector<1x128xf32>
    %c0_80 = arith.constant 0 : index
    %c0_81 = arith.constant 0 : index
    %c0_82 = arith.constant 0 : index
    %184 = vector.load %arg3[%c0_80, %c0_81, %c0_82] : memref<1x1x128xf32, #tpu.memory_space<vmem>>, vector<1x1x128xf32>
    %185 = vector.shape_cast %184 : vector<1x1x128xf32> to vector<1x128xf32>
    %186 = vector.shape_cast %183 : vector<1x128xf32> to vector<1x1x128xf32>
    tpu.vector_store %arg3[%c0_80, %c0_81, %c0_82], %186 {strides = array<i32>} : memref<1x1x128xf32, #tpu.memory_space<vmem>>, vector<1x1x128xf32>,
    return
  }
  func.func @transform_0(%arg0: i32) -> (i32, i32, i32) {
    %c0_i32 = arith.constant 0 : i32
    %c0_i32_0 = arith.constant 0 : i32
    %c0_i32_1 = arith.constant 0 : i32
    return %arg0, %c0_i32, %c0_i32_0 : i32, i32, i32
  }
  func.func @transform_1(%arg0: i32) -> (i32, i32) {
    %c0_i32 = arith.constant 0 : i32
    %c0_i32_0 = arith.constant 0 : i32
    %c0_i32_1 = arith.constant 0 : i32
    return %c0_i32, %c0_i32_0 : i32, i32
  }
  func.func @transform_2(%arg0: i32) -> (i32, i32, i32) {
    %c0_i32 = arith.constant 0 : i32
    %c0_i32_0 = arith.constant 0 : i32
    %c0_i32_1 = arith.constant 0 : i32
    return %arg0, %c0_i32, %c0_i32_0 : i32, i32, i32
  }
}

</mosaic_0001>

<bundles_post_ra>
// kernel: squeeze.1
= control target key start
LH: loop header
LB: loop body
LE: loop exit
PB: predicated region body
PF: predicated region fallthrough
CT: control target
= control target key end

     0   :  { %s51_s8 = smov 80   ;;  %vm8_vm0 = vcmask 130048   ;;  %s52_s11 = smov 96   ;;  %s92_s0 = inlined_call_operand.vmem [shape: f32[2,96], index: 0, kind: input, shape index: {}]   ;;  %s93_s1 = inlined_call_operand.vmem [shape: f32[2,6,16], index: 1, kind: output, shape index: {}]  }
   0x1   :  { %v5_v0 = vld [vmem:[%s92_s0] sm:$0x3]  ;;  %s50_s0 = smov 112   ;;  %s53_s12 = smov 64  }
   0x2   :  { %6 = vst [vmem:[#allocation0] sm:$0x3] %v5_v0  ;;  %s54_s13 = smov 48  }
   0x9   :  { %v10_v1 = vld [vmem:[#allocation0] sm:$0x3]  }
   0xa   :  { %v22_v2 = vld [vmem:[#allocation0] sm:$0x3]   ;;  %11 = vrot.lane.b32.xlu0 %v10_v1, %s50_s0 }
   0xb   :  { %23 = vrot.lane.b32.xlu1 %v22_v2, %s51_s8  ;;  %v7_v3 = vld [vmem:[#allocation0] sm:$0x3]  }
   0xc   :  { %v16_v4 = vld [vmem:[#allocation0] sm:$0x3]   ;;  %9 = vst.msk [vmem:[%s93_s1] ss:$8 sm:$0x3] %vm8_vm0, %v7_v3  }
   0xd   :  { %v28_v5 = vld [vmem:[#allocation0] sm:$0x3]  }
   0xe   :  { %17 = vrot.lane.b32.xlu0 %v16_v4, %s52_s11  ;;  %v34_v6 = vld [vmem:[#allocation0] sm:$0x3]  }
   0xf   :  { %29 = vrot.lane.b32.xlu1 %v28_v5, %s53_s12 }
  0x12   :  { %35 = vrot.lane.b32.xlu0 %v34_v6, %s54_s13 }
  0x7c   :  { %v12_v7 = vpop.permute.xlu0 %11  }
  0x7d   :  { %v24_v8 = vpop.permute.xlu1 %23   ;;  %40 = vst.msk [vmem:[%s93_s1 + $0x1] ss:$8 sm:$0x3] %vm8_vm0, %v12_v7  }
  0x7e   :  { %42 = vst.msk [vmem:[%s93_s1 + $0x3] ss:$8 sm:$0x3] %vm8_vm0, %v24_v8  }
  0x80   :  { %v18_v9 = vpop.permute.xlu0 %17  }
  0x81   :  { %v30_v10 = vpop.permute.xlu1 %29   ;;  %41 = vst.msk [vmem:[%s93_s1 + $0x2] ss:$8 sm:$0x3] %vm8_vm0, %v18_v9  }
  0x82   :  { %43 = vst.msk [vmem:[%s93_s1 + $0x4] ss:$8 sm:$0x3] %vm8_vm0, %v30_v10  }
  0x84   :  { %v36_v11 = vpop.permute.xlu0 %35  }
  0x85   :  { %44 = vst.msk [vmem:[%s93_s1 + $0x5] ss:$8 sm:$0x3] %vm8_vm0, %v36_v11  }

// kernel: forward.1
= control target key start
LH: loop header
LB: loop body
LE: loop exit
PB: predicated region body
PF: predicated region fallthrough
CT: control target
= control target key end

     0   :  { %7 = vsyncpa [#allocation3], 0  ;;  %s5443_s9 = smov 0   ;;  %s5877_s0 = inlined_call_operand.vmem [shape: f32[2,12,64], index: 0, kind: input, shape index: {}]   ;;  %s5878_s1 = inlined_call_operand.hbm [shape: bf16[4112,128], index: 1, kind: input, shape index: {}]   ;;  %s5879_s2 = inlined_call_operand.vmem [shape: f32[2,1,128], index: 2, kind: output, shape index: {}]  }
   0x1 LB: > { %s5449_s10 = sadd.s32 4294967295, %s5421_s9   ;;  %p3855_p0 = scmp.ge.s32.totalorder %s5421_s9, 1  ;;  %s5421_s9 = sphi %s5443_s9, %s13_s9  }
   0x2   : > { %p91_p1 = scmp.lt.s32.totalorder %s5421_s9, 3  ;;  %s5423_s11 = smov [#allocation2]  }
   0x3   : > { %s103_s12 = sshll.u32 %s5423_s11, 4  ;;  %p5089_p3 = scmp.eq.s32.totalorder %s5449_s10, 0  ;;  %s104_s12 = int_to_ptr.vmem [resolvable:$true] %s103_s12 }
   0x4   : > { %p5453_p2 = pnand %p3855_p0, %p91_p1  ;;  %s5396_s14 = scalar_lea.vmem %s104_s12, 32896 }
   0x5   : > { %p5397_p7 = scmp.ne.s32.totalorder %s104_s12, %s5396_s14  ;;  %p5404_p10 = scmp.lt.s32.totalorder %s104_s12, %s104_s12 }
   0x6   : > { %p5085_p4 = pneg %p5453_p2  ;;  %p5405_p11 = scmp.lt.s32.totalorder %s5396_s14, %s5396_s14 }
   0x8   : > { %p5086_p5 = pnand %p5089_p3, %p5085_p4  ;;  %p5406_p12 = por %p5405_p11, %p5404_p10 }
   0xa   : > { %p5387_p6 = pneg %p5086_p5 }
   0xc   : > { %p5399_p8 = pnand %p5397_p7, %p5387_p6 }
   0xe   : > { %p5400_p9 = pneg %p5399_p8 }
  0x10   : > { %p5407_p13 = pnand %p5406_p12, %p5400_p9 }
  0x12   : > { %5410 = shalt.err (!%p5407_p13)
}
  0x13   : > { %s5424_s15 = smov 64   ;;  %s5425_s16 = smov 4  }
  0x14   : > { %5088 = dma.hbm_to_vmem [thread:$0]  (!%p5086_p5), %s5878_s1, 32896, %s104_s12, [#allocation3], %s5424_s15, %s5424_s15, %s5425_s16  }
  0x15   : > { %127 = sbr.rel (%p5453_p2) target bundleno = 2167 (0x877), region = 28 }
  0x1a   : > { %5416 = dma.done.wait (%p5089_p3), [#allocation3], 32896  }
  0x1b   : > { %5418 = vsyncadd (%p5089_p3), [#allocation3], 4294934400  ;;  %v5426_v0 = vmov 0.0   ;;  %p147_p0 = scmp.lt.s32.totalorder %s5449_s10, 1  ;;  %vm5427_vm0 = vmmov 0   ;;  %v5104_v1 = vld [vmem:[#allocation2 + $0x38] sm:$0xff]  }
  0x1c   : > { %4429 = vmatprep.subr.bf16.mxu1 %v5426_v0  ;;  %4453 = vmatprep.subr.bf16.mxu0 %v5426_v0  ;;  %v5105_v2 = vld [vmem:[#allocation2 + $0x18] sm:$0xff]   ;;  %v5106_v3 = vld [vmem:[#allocation2 + $0x30] sm:$0xff]   ;;  %v5108_v5 = vld [vmem:[#allocation2 + $0x28] sm:$0xff]   ;;  %vm226_vm1 = vcmask 523264  }
  0x1d   : > { %4437 = vmatprep.mubr.msk.bf16.mxu1 %vm5427_vm0, %v5426_v0  ;;  %4461 = vmatprep.mubr.msk.bf16.mxu0 %vm5427_vm0, %v5426_v0  ;;  %s5882_s10 = smov (!%p147_p0, %s5449_s10), 1  ;;  %v5107_v4 = vld [vmem:[#allocation2 + $0x10] sm:$0xff]   ;;  %v5109_v6 = vld [vmem:[#allocation2 + $0x8] sm:$0xff]   ;;  %v5110_v10 = vld [vmem:[#allocation2 + $0x20] sm:$0xff]  }
  0x1e   : > { %4430 = vmatpush3.bf16.msra.mxu1 %v5104_v1  ;;  %s4132_s19 = sshll.u32 %s5882_s10, 4  ;;  %4454 = vmatpush3.bf16.msra.mxu0 %v5105_v2  ;;  %v5111_v11 = vld [vmem:[#allocation2] sm:$0xff]   ;;  %v5112_v15 = vld [vmem:[#allocation2 + $0x98] sm:$0xff]   ;;  %v5114_v18 = vld [vmem:[#allocation2 + $0x90] sm:$0xff]   ;;  %s154_s25 = scalar_lea.vmem %s5879_s2, %s5882_s10 }
  0x1f   : > { %4431 = vmatprep.subr.bf16.mxu1 %v5426_v0  ;;  %4455 = vmatprep.subr.bf16.mxu0 %v5426_v0  ;;  %s151_s22 = scalar_lea.vmem %s5877_s0, %s4132_s19  ;;  %v5113_v17 = vld [vmem:[#allocation2 + $0x58] sm:$0xff]   ;;  %v5115_v19 = vld [vmem:[#allocation2 + $0x50] sm:$0xff]   ;;  %v5116_v20 = vld [vmem:[#allocation2 + $0x88] sm:$0xff]  }
  0x20   : > { %v160_v7 = vld [vmem:[%s151_s22] sm:$0xff]  ;;  %v161_v8 = vld [vmem:[%s151_s22 + $0x8] sm:$0xf]  ;;  %v5120_v25 = vld [vmem:[#allocation2 + $0x78] sm:$0xff]  }
  0x21   : > { %v5489_v9 = vpack.c.bf16 %v161_v8, %v160_v7  ;;  %v5117_v21 = vld [vmem:[#allocation2 + $0x48] sm:$0xff]   ;;  %v5118_v22 = vld [vmem:[#allocation2 + $0x80] sm:$0xff]   ;;  %v5121_v26 = vld [vmem:[#allocation2 + $0x70] sm:$0xff]  }
  0x22   : > { %4432 = vmatpush3.bf16.msra.mxu1 %v5106_v3  ;;  %4456 = vmatpush3.bf16.msra.mxu0 %v5107_v4  ;;  %v5119_v24 = vld [vmem:[#allocation2 + $0x40] sm:$0xff]   ;;  %v5122_v27 = vld [vmem:[#allocation2 + $0x68] sm:$0xff]   ;;  %v5124_v29 = vld [vmem:[#allocation2 + $0xb8] sm:$0xff]  }
  0x23   : > { %4433 = vmatprep.subr.bf16.mxu1 %v5426_v0  ;;  %4457 = vmatprep.subr.bf16.mxu0 %v5426_v0  ;;  %v196_v12 = vshrl.u32 %v5489_v9, 16  ;;  %v198_v13 = vshll.u32 %v5489_v9, 16  ;;  %v485_v23 = vrot.slane %v5489_v9, 1  ;;  %v5123_v28 = vld [vmem:[#allocation2 + $0x60] sm:$0xff]   ;;  %v5125_v30 = vld [vmem:[#allocation2 + $0xb0] sm:$0xff]   ;;  %v5126_v31 = vld [vmem:[#allocation2 + $0xa8] sm:$0xff]  }
  0x24   : > { %v5127_v32 = vld [vmem:[#allocation2 + $0xa0] sm:$0xff]   ;;  %v5128_v33 = vld [vmem:[#allocation2 + $0xf8] sm:$0xff]   ;;  %v5129_v34 = vld [vmem:[#allocation2 + $0xf0] sm:$0xff]  }
  0x25   : > { %v200_v14 = vrot.slane %v198_v13, 1  ;;  %v5130_v35 = vld [vmem:[#allocation2 + $0xe8] sm:$0xff]   ;;  %v5131_v36 = vld [vmem:[#allocation2 + $0xe0] sm:$0xff]   ;;  %v5132_v37 = vld [vmem:[#allocation2 + $0xd8] sm:$0xff]  }
  0x26   : > { %4434 = vmatpush3.bf16.msra.mxu1 %v5108_v5  ;;  %4458 = vmatpush3.bf16.msra.mxu0 %v5109_v6  ;;  %v5133_v38 = vld [vmem:[#allocation2 + $0xd0] sm:$0xff]   ;;  %v5134_v39 = vld [vmem:[#allocation2 + $0xc8] sm:$0xff]   ;;  %v5135_v40 = vld [vmem:[#allocation2 + $0xc0] sm:$0xff]   ;;  %v623_v5 = vlaneseq }
  0x27   : > { %4435 = vmatprep.subr.bf16.mxu1 %v5426_v0  ;;  %4459 = vmatprep.subr.bf16.mxu0 %v5426_v0  ;;  %v201_v16 = vor.u32 %v200_v14, %v196_v12  ;;  %v5136_v41 = vld [vmem:[#allocation2 + $0x178] sm:$0xff]   ;;  %v5138_v42 = vld [vmem:[#allocation2 + $0x170] sm:$0xff]   ;;  %v5140_v43 = vld [vmem:[#allocation2 + $0x168] sm:$0xff]  }
  0x28   : > { %v5142_v44 = vld [vmem:[#allocation2 + $0x160] sm:$0xff]   ;;  %v5144_v45 = vld [vmem:[#allocation2 + $0x158] sm:$0xff]   ;;  %v5547_v7 = vshrl.u32 %v623_v5, 7 }
  0x29   : > { %v4137_v8 = vld [vmem:[#allocation2 + $0x800] sm:$0xff]   ;;  %v5160_v5 = vld [vmem:[#allocation2 + $0x118] sm:$0xff]  }
  0x2a   : > { %4436 = vmatpush3.bf16.msra.mxu1 %v5110_v10  ;;  %4460 = vmatpush3.bf16.msra.mxu0 %v5111_v11  ;;  %v5550_v10 = vunpack.c.l.bf16 %v4137_v8  ;;  %v5162_v8 = vld [vmem:[#allocation2 + $0x110] sm:$0xff]  }
  0x2b   : > { %4441 = vmatprep.subr.bf16.mxu1 %v5426_v0  ;;  %4477 = vmatprep.subr.bf16.mxu0 %v5426_v0 }
  0x2d   : > { %4438 = vmatmul.mubr.msk.bf16.vlgmr.msra.gmra.mxu1 %vm226_vm1, %v201_v16  ;;  %4462 = vmatmul.mubr.msk.bf16.vlgmr.msra.gmra.mxu0 %vm226_vm1, %v5489_v9 }
  0x2e   : > { %4442 = vmatpush3.bf16.msra.mxu1 %v5112_v15  ;;  %4478 = vmatpush3.bf16.msra.mxu0 %v5113_v17 }
  0x2f   : > { %4443 = vmatprep.subr.bf16.mxu1 %v5426_v0  ;;  %4479 = vmatprep.subr.bf16.mxu0 %v5426_v0 }
  0x30   : > { %4449 = vmatprep.mubr.msk.bf16.mxu1 %vm5427_vm0, %v5426_v0  ;;  %4485 = vmatprep.mubr.msk.bf16.mxu0 %vm5427_vm0, %v5426_v0 }
  0x32   : > { %4444 = vmatpush3.bf16.msra.mxu1 %v5114_v18  ;;  %4480 = vmatpush3.bf16.msra.mxu0 %v5115_v19 }
  0x33   : > { %4445 = vmatprep.subr.bf16.mxu1 %v5426_v0  ;;  %4481 = vmatprep.subr.bf16.mxu0 %v5426_v0 }
  0x36   : > { %4446 = vmatpush3.bf16.msra.mxu1 %v5116_v20  ;;  %4482 = vmatpush3.bf16.msra.mxu0 %v5117_v21 }
  0x37   : > { %4447 = vmatprep.subr.bf16.mxu1 %v5426_v0  ;;  %4483 = vmatprep.subr.bf16.mxu0 %v5426_v0 }
  0x3a   : > { %4448 = vmatpush3.bf16.msra.mxu1 %v5118_v22  ;;  %4484 = vmatpush3.bf16.msra.mxu0 %v5119_v24 }
  0x3b   : > { %4465 = vmatprep.subr.bf16.mxu1 %v5426_v0  ;;  %4501 = vmatprep.subr.bf16.mxu0 %v5426_v0 }
  0x3d   : > { %4450 = vmatmul.mubr.msk.bf16.vlgmr.msra.gmra.mxu1 %vm226_vm1, %v201_v16  ;;  %4486 = vmatmul.mubr.msk.bf16.vlgmr.msra.gmra.mxu0 %vm226_vm1, %v485_v23 }
  0x3e   : > { %4466 = vmatpush3.bf16.msra.mxu1 %v5120_v25  ;;  %4473 = vmatprep.mubr.msk.bf16.mxu1 %vm5427_vm0, %v5426_v0 }
  0x3f   : > { %4467 = vmatprep.subr.bf16.mxu1 %v5426_v0  ;;  %4517 = vmatprep.mubr.msk.bf16.mxu0 %vm5427_vm0, %v5426_v0 }
  0x40   : > { %4502 = vmatpush3.bf16.msra.mxu0 %v5128_v33 }
  0x41   : > { %4503 = vmatprep.subr.bf16.mxu0 %v5426_v0 }
  0x42   : > { %4468 = vmatpush3.bf16.msra.mxu1 %v5121_v26 }
  0x43   : > { %4469 = vmatprep.subr.bf16.mxu1 %v5426_v0 }
  0x44   : > { %4504 = vmatpush3.bf16.msra.mxu0 %v5129_v34 }
  0x45   : > { %4505 = vmatprep.subr.bf16.mxu0 %v5426_v0 }
  0x46   : > { %4470 = vmatpush3.bf16.msra.mxu1 %v5122_v27 }
  0x47   : > { %4471 = vmatprep.subr.bf16.mxu1 %v5426_v0 }
  0x48   : > { %4506 = vmatpush3.bf16.msra.mxu0 %v5130_v35 }
  0x49   : > { %4507 = vmatprep.subr.bf16.mxu0 %v5426_v0 }
  0x4a   : > { %4472 = vmatpush3.bf16.msra.mxu1 %v5123_v28  ;;  %v625_v28 = vsub.s32 0, %v5547_v7 }
  0x4b   : > { %4489 = vmatprep.subr.bf16.mxu1 %v5426_v0 }
  0x4c   : > { %4508 = vmatpush3.bf16.msra.mxu0 %v5131_v36 }
  0x4d   : > { %4474 = vmatmul.mubr.msk.bf16.vlgmr.msra.gmra.mxu1 %vm226_vm1, %v5489_v9  ;;  %4509 = vmatprep.subr.bf16.mxu0 %v5426_v0  ;;  %v631_v9 = vsub.s32 1, %v5547_v7 }
  0x4e   : > { %4490 = vmatpush3.bf16.msra.mxu1 %v5124_v29  ;;  %4497 = vmatprep.mubr.msk.bf16.mxu1 %vm5427_vm0, %v5426_v0  ;;  %v626_v29 = vrot.slane %v5550_v10, %v625_v28  ;;  %v5181_v28 = vld [vmem:[#allocation2 + $0x248] sm:$0xff]  }
  0x4f   : > { %4491 = vmatprep.subr.bf16.mxu1 %v5426_v0  ;;  %v632_v12 = vrot.slane %v5550_v10, %v631_v9  ;;  %v5163_v9 = vld [vmem:[#allocation2 + $0x1d0] sm:$0xff]  }
  0x50   : > { %4510 = vmatpush3.bf16.msra.mxu0 %v5132_v37  ;;  %v5137_v37 = vld [vmem:[#allocation2 + $0x238] sm:$0xff]  }
  0x51   : > { %4511 = vmatprep.subr.bf16.mxu0 %v5426_v0 }
  0x52   : > { %4492 = vmatpush3.bf16.msra.mxu1 %v5125_v30 }
  0x53   : > { %4493 = vmatprep.subr.bf16.mxu1 %v5426_v0 }
  0x54   : > { %4512 = vmatpush3.bf16.msra.mxu0 %v5133_v38 }
  0x55   : > { %4513 = vmatprep.subr.bf16.mxu0 %v5426_v0 }
  0x56   : > { %4494 = vmatpush3.bf16.msra.mxu1 %v5126_v31 }
  0x57   : > { %4495 = vmatprep.subr.bf16.mxu1 %v5426_v0 }
  0x58   : > { %4514 = vmatpush3.bf16.msra.mxu0 %v5134_v39  ;;  %v5139_v39 = vld [vmem:[#allocation2 + $0x230] sm:$0xff]  }
  0x59   : > { %4515 = vmatprep.subr.bf16.mxu0 %v5426_v0 }
  0x5a   : > { %4496 = vmatpush3.bf16.msra.mxu1 %v5127_v32 }
  0x5b   : > { %4521 = vmatprep.subr.bf16.mxu1 %v5426_v0 }
  0x5c   : > { %4516 = vmatpush3.bf16.msra.mxu0 %v5135_v40  ;;  %v5141_v40 = vld [vmem:[#allocation2 + $0x228] sm:$0xff]  }
  0x5d   : > { %4498 = vmatmul.mubr.msk.bf16.vlgmr.msra.gmra.mxu1 %vm226_vm1, %v485_v23  ;;  %4541 = vmatprep.subr.bf16.mxu0 %v5426_v0 }
  0x5e   : > { %4537 = vmatprep.mubr.msk.bf16.mxu1 %vm5427_vm0, %v5426_v0  ;;  %4522 = vmatpush3.bf16.msra.mxu1 %v5136_v41  ;;  %v5143_v41 = vld [vmem:[#allocation2 + $0x220] sm:$0xff]  }
  0x5f   : > { %4523 = vmatprep.subr.bf16.mxu1 %v5426_v0 }
  0x62   : > { %4524 = vmatpush3.bf16.msra.mxu1 %v5138_v42  ;;  %v5145_v42 = vld [vmem:[#allocation2 + $0x218] sm:$0xff]  }
  0x63   : > { %4525 = vmatprep.subr.bf16.mxu1 %v5426_v0 }
  0x66   : > { %4526 = vmatpush3.bf16.msra.mxu1 %v5140_v43  ;;  %v5146_v43 = vld [vmem:[#allocation2 + $0x150] sm:$0xff]  }
  0x67   : > { %4527 = vmatprep.subr.bf16.mxu1 %v5426_v0 }
  0x6a   : > { %4528 = vmatpush3.bf16.msra.mxu1 %v5142_v44  ;;  %v5147_v44 = vld [vmem:[#allocation2 + $0x210] sm:$0xff]  }
  0x6b   : > { %4529 = vmatprep.subr.bf16.mxu1 %v5426_v0 }
  0x6e   : > { %4530 = vmatpush3.bf16.msra.mxu1 %v5144_v45  ;;  %v5148_v45 = vld [vmem:[#allocation2 + $0x148] sm:$0xff]  }
  0x6f   : > { %4531 = vmatprep.subr.bf16.mxu1 %v5426_v0 }
  0x72   : > { %4532 = vmatpush3.bf16.msra.mxu1 %v5146_v43  ;;  %v5195_v43 = vld [vmem:[#allocation2 + $0x390] sm:$0xff]  }
  0x73   : > { %4533 = vmatprep.subr.bf16.mxu1 %v5426_v0 }
  0x76   : > { %4534 = vmatpush3.bf16.msra.mxu1 %v5148_v45  ;;  %v5197_v45 = vld [vmem:[#allocation2 + $0x388] sm:$0xff]  }
  0x77   : > { %4535 = vmatprep.subr.bf16.mxu1 %v5426_v0 }
  0xed   : > { %v264_v46 = vpop.f32.mrf.mxu1  ;;  %v396_v47 = vpop.f32.mrf.mxu0 }
  0xee   : > { %v397_v48 = vadd.f32 %v396_v47, %v264_v46  ;;  %v5149_v46 = vld [vmem:[#allocation2 + $0x208] sm:$0xff]   ;;  %v5150_v47 = vld [vmem:[#allocation2 + $0x140] sm:$0xff]  }
  0xef   : > { %v4439_v49 = vpop.f32.mrf.mxu1  ;;  %v4463_v50 = vpop.f32.mrf.mxu0  ;;  %4536 = vmatpush3.bf16.msra.mxu1 %v5150_v47  ;;  %v5199_v47 = vld [vmem:[#allocation2 + $0x380] sm:$0xff]  }
  0xf0   : > { %4561 = vmatprep.subr.bf16.mxu1 %v5426_v0 }
  0xf1   : > { %v267_v51 = vpop.f32.mrf.mxu1  ;;  %v399_v52 = vpop.f32.mrf.mxu0 }
  0xf2   : > { %v400_v53 = vadd.f32 %v399_v52, %v267_v51 }
  0xf3   : > { %v4440_v54 = vpop.f32.mrf.mxu1  ;;  %v4464_v55 = vpop.f32.mrf.mxu0 }
  0xfd   : > { %v329_v56 = vpop.f32.mrf.mxu1  ;;  %v547_v57 = vpop.f32.mrf.mxu0 }
  0xfe   : > { %v619_v58 = vadd.f32 %v547_v57, %v397_v48  ;;  %v5151_v48 = vld [vmem:[#allocation2 + $0x200] sm:$0xff]  }
  0xff   : > { %v4451_v59 = vpop.f32.mrf.mxu1  ;;  %v4487_v60 = vpop.f32.mrf.mxu0 }
 0x100   : > { %v627_v32 = vadd.f32 %v626_v29, %v619_v58  ;;  %v5152_v59 = vld [vmem:[#allocation2 + $0x138] sm:$0xff]  }
 0x101   : > { %v332_v61 = vpop.f32.mrf.mxu1  ;;  %v550_v62 = vpop.f32.mrf.mxu0  ;;  %v5153_v60 = vld [vmem:[#allocation2 + $0x1f8] sm:$0xff]  }
 0x102   : > { %v620_v30 = vadd.f32 %v550_v62, %v400_v53  ;;  %v5154_v62 = vld [vmem:[#allocation2 + $0x130] sm:$0xff]  }
 0x103   : > { %v4452_v63 = vpop.f32.mrf.mxu1  ;;  %v4488_v1 = vpop.f32.mrf.mxu0 }
 0x104   : > { %v628_v33 = vadd.f32 %v626_v29, %v620_v30  ;;  %v5155_v63 = vld [vmem:[#allocation2 + $0x1f0] sm:$0xff]   ;;  %v5156_v1 = vld [vmem:[#allocation2 + $0x128] sm:$0xff]   ;;  %v5182_v29 = vld [vmem:[#allocation2 + $0x180] sm:$0xff]  }
 0x105   : > { %v5183_v30 = vld [vmem:[#allocation2 + $0x240] sm:$0xff]  }
 0x10d   : > { %v461_v2 = vpop.f32.mrf.mxu1 }
 0x10e   : > { %v462_v11 = vadd.f32 %v461_v2, %v329_v56  ;;  %v5157_v2 = vld [vmem:[#allocation2 + $0x1e8] sm:$0xff]  }
 0x10f   : > { %v4475_v3 = vpop.f32.mrf.mxu1 }
 0x110   : > { %v5158_v3 = vld [vmem:[#allocation2 + $0x120] sm:$0xff]  }
 0x111   : > { %v464_v4 = vpop.f32.mrf.mxu1 }
 0x112   : > { %v465_v16 = vadd.f32 %v464_v4, %v332_v61  ;;  %v5159_v4 = vld [vmem:[#allocation2 + $0x1e0] sm:$0xff]  }
 0x113   : > { %v4476_v6 = vpop.f32.mrf.mxu1 }
 0x114   : > { %v5161_v6 = vld [vmem:[#allocation2 + $0x1d8] sm:$0xff]  }
 0x11d   : > { %v612_v13 = vpop.f32.mrf.mxu1 }
 0x11e   : > { %v621_v14 = vadd.f32 %v612_v13, %v462_v11  ;;  %v5164_v11 = vld [vmem:[#allocation2 + $0x108] sm:$0xff]   ;;  %v5166_v13 = vld [vmem:[#allocation2 + $0x100] sm:$0xff]  }
 0x11f   : > { %v4499_v15 = vpop.f32.mrf.mxu1 }
 0x120   : > { %v633_v17 = vadd.f32 %v632_v12, %v621_v14  ;;  %v5167_v14 = vld [vmem:[#allocation2 + $0x1c0] sm:$0xff]   ;;  %v5168_v15 = vld [vmem:[#allocation2 + $0x1b8] sm:$0xff]  }
 0x121   : > { %v615_v18 = vpop.f32.mrf.mxu1 }
 0x122   : > { %v3892_v19 = vmul.f32 -1.442695, %v633_v17  ;;  %v622_v20 = vadd.f32 %v615_v18, %v465_v16  ;;  %v5169_v16 = vld [vmem:[#allocation2 + $0x278] sm:$0xff]   ;;  %v5170_v17 = vld [vmem:[#allocation2 + $0x1b0] sm:$0xff]  }
 0x123   : > { %v4500_v21 = vpop.f32.mrf.mxu1  ;;  %v5171_v18 = vld [vmem:[#allocation2 + $0x270] sm:$0xff]  }
 0x124   : > { %5360 = vpow2.f32 %v3892_v19  ;;  %v634_v22 = vadd.f32 %v632_v12, %v622_v20  ;;  %v5165_v12 = vld [vmem:[#allocation2 + $0x1c8] sm:$0xff]   ;;  %v5174_v21 = vld [vmem:[#allocation2 + $0x1a0] sm:$0xff]  }
 0x125   : > { %v5172_v19 = vld [vmem:[#allocation2 + $0x1a8] sm:$0xff]  }
 0x126   : > { %v3893_v23 = vmul.f32 -1.442695, %v634_v22  ;;  %v5173_v20 = vld [vmem:[#allocation2 + $0x268] sm:$0xff]   ;;  %v5175_v22 = vld [vmem:[#allocation2 + $0x260] sm:$0xff]  }
 0x128   : > { %5362 = vpow2.f32 %v3893_v23  ;;  %v5176_v23 = vld [vmem:[#allocation2 + $0x198] sm:$0xff]  }
 0x131   : > { %v5361_v24 = vpop.eup %5360 }
 0x132   : > { %v641_v25 = vadd.f32 1.0, %v5361_v24  ;;  %v5177_v24 = vld [vmem:[#allocation2 + $0x258] sm:$0xff]  }
 0x134   : > { %5364 = vrcp.f32 %v641_v25  ;;  %v5178_v25 = vld [vmem:[#allocation2 + $0x190] sm:$0xff]  }
 0x135   : > { %v5363_v26 = vpop.eup %5362 }
 0x136   : > { %v642_v27 = vadd.f32 1.0, %v5363_v26  ;;  %v5179_v26 = vld [vmem:[#allocation2 + $0x250] sm:$0xff]  }
 0x138   : > { %5366 = vrcp.f32 %v642_v27  ;;  %v5180_v27 = vld [vmem:[#allocation2 + $0x188] sm:$0xff]  }
 0x141   : > { %v5365_v31 = vpop.eup %5364 }
 0x142   : > { %v647_v35 = vmul.f32 %v5365_v31, %v627_v32  ;;  %v5184_v32 = vld [vmem:[#allocation2 + $0x2f8] sm:$0xff]  }
 0x145   : > { %v5367_v34 = vpop.eup %5366 }
 0x146   : > { %v648_v36 = vmul.f32 %v5367_v34, %v628_v33  ;;  %v5185_v33 = vld [vmem:[#allocation2 + $0x3b8] sm:$0xff]   ;;  %v5186_v34 = vld [vmem:[#allocation2 + $0x2f0] sm:$0xff]  }
 0x148   : > { %v665_v38 = vpack.c.bf16 %v648_v36, %v647_v35  ;;  %v5187_v35 = vld [vmem:[#allocation2 + $0x3b0] sm:$0xff]   ;;  %v5188_v36 = vld [vmem:[#allocation2 + $0x2e8] sm:$0xff]  }
 0x14a   : > { %4518 = vmatmul.mubr.bf16.vlgmr.msra.gmra.mxu0 %v665_v38  ;;  %v5190_v38 = vld [vmem:[#allocation2 + $0x2e0] sm:$0xff]  }
 0x14b   : > { %4542 = vmatpush3.bf16.msra.mxu0 %v5137_v37  ;;  %4557 = vmatprep.mubr.msk.bf16.mxu0 %vm5427_vm0, %v5426_v0  ;;  %v5189_v37 = vld [vmem:[#allocation2 + $0x3a8] sm:$0xff]  }
 0x14c   : > { %4543 = vmatprep.subr.bf16.mxu0 %v5426_v0 }
 0x14f   : > { %4544 = vmatpush3.bf16.msra.mxu0 %v5139_v39  ;;  %v5191_v39 = vld [vmem:[#allocation2 + $0x3a0] sm:$0xff]  }
 0x150   : > { %4545 = vmatprep.subr.bf16.mxu0 %v5426_v0 }
 0x153   : > { %4546 = vmatpush3.bf16.msra.mxu0 %v5141_v40  ;;  %v5192_v40 = vld [vmem:[#allocation2 + $0x2d8] sm:$0xff]  }
 0x154   : > { %4547 = vmatprep.subr.bf16.mxu0 %v5426_v0 }
 0x157   : > { %4548 = vmatpush3.bf16.msra.mxu0 %v5143_v41  ;;  %v5193_v41 = vld [vmem:[#allocation2 + $0x398] sm:$0xff]  }
 0x158   : > { %4549 = vmatprep.subr.bf16.mxu0 %v5426_v0 }
 0x15b   : > { %4550 = vmatpush3.bf16.msra.mxu0 %v5145_v42  ;;  %v5194_v42 = vld [vmem:[#allocation2 + $0x2d0] sm:$0xff]  }
 0x15c   : > { %4551 = vmatprep.subr.bf16.mxu0 %v5426_v0 }
 0x15f   : > { %4552 = vmatpush3.bf16.msra.mxu0 %v5147_v44  ;;  %v5196_v44 = vld [vmem:[#allocation2 + $0x2c8] sm:$0xff]  }
 0x160   : > { %4553 = vmatprep.subr.bf16.mxu0 %v5426_v0 }
 0x163   : > { %4554 = vmatpush3.bf16.msra.mxu0 %v5149_v46  ;;  %v5198_v46 = vld [vmem:[#allocation2 + $0x2c0] sm:$0xff]  }
 0x164   : > { %4555 = vmatprep.subr.bf16.mxu0 %v5426_v0 }
 0x167   : > { %4556 = vmatpush3.bf16.msra.mxu0 %v5151_v48 }
 0x168   : > { %4581 = vmatprep.subr.bf16.mxu0 %v5426_v0 }
 0x20a   : > { %v748_v49 = vpop.f32.mrf.mxu0 }
 0x20b   : > { %v755_v52 = vmax.f32 %v748_v49, 0.0 }
 0x20c   : > { %v4519_v50 = vpop.f32.mrf.mxu0 }
 0x20e   : > { %v751_v51 = vpop.f32.mrf.mxu0 }
 0x20f   : > { %v756_v53 = vmax.f32 %v751_v51, 0.0 }
 0x210   : > { %v4520_v54 = vpop.f32.mrf.mxu0 }
 0x211   : > { %v5568_v55 = vpack.c.bf16 %v756_v53, %v755_v52 }
 0x213   : > { %v825_v56 = vshll.u32 %v5568_v55, 16  ;;  %v823_v57 = vshrl.u32 %v5568_v55, 16  ;;  %v1215_v31 = vrot.slane %v5568_v55, 1 }
 0x215   : > { %v827_v58 = vrot.slane %v825_v56, 1 }
 0x217   : > { %v828_v61 = vor.u32 %v827_v58, %v823_v57 }
 0x219   : > { %4538 = vmatmul.mubr.bf16.vlgmr.msra.gmra.mxu1 %v828_v61  ;;  %4558 = vmatmul.mubr.bf16.vlgmr.msra.gmra.mxu0 %v828_v61 }
 0x21a   : > { %4562 = vmatpush3.bf16.msra.mxu1 %v5152_v59  ;;  %4582 = vmatpush3.bf16.msra.mxu0 %v5153_v60 }
 0x21b   : > { %4563 = vmatprep.subr.bf16.mxu1 %v5426_v0  ;;  %4583 = vmatprep.subr.bf16.mxu0 %v5426_v0 }
 0x21c   : > { %4577 = vmatprep.mubr.msk.bf16.mxu1 %vm5427_vm0, %v5426_v0  ;;  %4597 = vmatprep.mubr.msk.bf16.mxu0 %vm5427_vm0, %v5426_v0 }
 0x21e   : > { %4564 = vmatpush3.bf16.msra.mxu1 %v5154_v62  ;;  %4584 = vmatpush3.bf16.msra.mxu0 %v5155_v63 }
 0x21f   : > { %4565 = vmatprep.subr.bf16.mxu1 %v5426_v0  ;;  %4585 = vmatprep.subr.bf16.mxu0 %v5426_v0 }
 0x222   : > { %4566 = vmatpush3.bf16.msra.mxu1 %v5156_v1  ;;  %4586 = vmatpush3.bf16.msra.mxu0 %v5157_v2  ;;  %v1402_v1 = vsub.s32 3, %v5547_v7 }
 0x223   : > { %4567 = vmatprep.subr.bf16.mxu1 %v5426_v0  ;;  %4587 = vmatprep.subr.bf16.mxu0 %v5426_v0 }
 0x226   : > { %4568 = vmatpush3.bf16.msra.mxu1 %v5158_v3  ;;  %4588 = vmatpush3.bf16.msra.mxu0 %v5159_v4  ;;  %v1403_v3 = vrot.slane %v5550_v10, %v1402_v1  ;;  %v5232_v1 = vld [vmem:[#allocation2 + $0x438] sm:$0xff]  }
 0x227   : > { %4569 = vmatprep.subr.bf16.mxu1 %v5426_v0  ;;  %4589 = vmatprep.subr.bf16.mxu0 %v5426_v0 }
 0x22a   : > { %4570 = vmatpush3.bf16.msra.mxu1 %v5160_v5  ;;  %4590 = vmatpush3.bf16.msra.mxu0 %v5161_v6 }
 0x22b   : > { %4571 = vmatprep.subr.bf16.mxu1 %v5426_v0  ;;  %4591 = vmatprep.subr.bf16.mxu0 %v5426_v0 }
 0x22e   : > { %4572 = vmatpush3.bf16.msra.mxu1 %v5162_v8  ;;  %4592 = vmatpush3.bf16.msra.mxu0 %v5163_v9 }
 0x22f   : > { %4573 = vmatprep.subr.bf16.mxu1 %v5426_v0  ;;  %4593 = vmatprep.subr.bf16.mxu0 %v5426_v0 }
 0x232   : > { %4574 = vmatpush3.bf16.msra.mxu1 %v5164_v11  ;;  %4594 = vmatpush3.bf16.msra.mxu0 %v5165_v12 }
 0x233   : > { %4575 = vmatprep.subr.bf16.mxu1 %v5426_v0  ;;  %4595 = vmatprep.subr.bf16.mxu0 %v5426_v0 }
 0x236   : > { %4576 = vmatpush3.bf16.msra.mxu1 %v5166_v13  ;;  %4596 = vmatpush3.bf16.msra.mxu0 %v5167_v14 }
 0x237   : > { %4601 = vmatprep.subr.bf16.mxu1 %v5426_v0  ;;  %4621 = vmatprep.subr.bf16.mxu0 %v5426_v0 }
 0x239   : > { %4578 = vmatmul.mubr.bf16.vlgmr.msra.gmra.mxu1 %v5568_v55  ;;  %4598 = vmatmul.mubr.bf16.vlgmr.msra.gmra.mxu0 %v5568_v55 }
 0x23a   : > { %4602 = vmatpush3.bf16.msra.mxu1 %v5168_v15  ;;  %4622 = vmatpush3.bf16.msra.mxu0 %v5169_v16 }
 0x23b   : > { %4603 = vmatprep.subr.bf16.mxu1 %v5426_v0  ;;  %4623 = vmatprep.subr.bf16.mxu0 %v5426_v0 }
 0x23c   : > { %4617 = vmatprep.mubr.msk.bf16.mxu1 %vm5427_vm0, %v5426_v0  ;;  %4637 = vmatprep.mubr.msk.bf16.mxu0 %vm5427_vm0, %v5426_v0 }
 0x23e   : > { %4604 = vmatpush3.bf16.msra.mxu1 %v5170_v17  ;;  %4624 = vmatpush3.bf16.msra.mxu0 %v5171_v18 }
 0x23f   : > { %4605 = vmatprep.subr.bf16.mxu1 %v5426_v0  ;;  %4625 = vmatprep.subr.bf16.mxu0 %v5426_v0 }
 0x242   : > { %4606 = vmatpush3.bf16.msra.mxu1 %v5172_v19  ;;  %4626 = vmatpush3.bf16.msra.mxu0 %v5173_v20  ;;  %v1397_v19 = vsub.s32 2, %v5547_v7 }
 0x243   : > { %4607 = vmatprep.subr.bf16.mxu1 %v5426_v0  ;;  %4627 = vmatprep.subr.bf16.mxu0 %v5426_v0 }
 0x246   : > { %4608 = vmatpush3.bf16.msra.mxu1 %v5174_v21  ;;  %4628 = vmatpush3.bf16.msra.mxu0 %v5175_v22  ;;  %v1398_v22 = vrot.slane %v5550_v10, %v1397_v19 }
 0x247   : > { %4609 = vmatprep.subr.bf16.mxu1 %v5426_v0  ;;  %4629 = vmatprep.subr.bf16.mxu0 %v5426_v0 }
 0x24a   : > { %4610 = vmatpush3.bf16.msra.mxu1 %v5176_v23  ;;  %4630 = vmatpush3.bf16.msra.mxu0 %v5177_v24 }
 0x24b   : > { %4611 = vmatprep.subr.bf16.mxu1 %v5426_v0  ;;  %4631 = vmatprep.subr.bf16.mxu0 %v5426_v0 }
 0x24e   : > { %4612 = vmatpush3.bf16.msra.mxu1 %v5178_v25  ;;  %4632 = vmatpush3.bf16.msra.mxu0 %v5179_v26 }
 0x24f   : > { %4613 = vmatprep.subr.bf16.mxu1 %v5426_v0  ;;  %4633 = vmatprep.subr.bf16.mxu0 %v5426_v0 }
 0x252   : > { %4614 = vmatpush3.bf16.msra.mxu1 %v5180_v27  ;;  %4634 = vmatpush3.bf16.msra.mxu0 %v5181_v28 }
 0x253   : > { %4615 = vmatprep.subr.bf16.mxu1 %v5426_v0  ;;  %4635 = vmatprep.subr.bf16.mxu0 %v5426_v0 }
 0x256   : > { %4616 = vmatpush3.bf16.msra.mxu1 %v5182_v29  ;;  %4636 = vmatpush3.bf16.msra.mxu0 %v5183_v30  ;;  %v5200_v30 = vld [vmem:[#allocation2 + $0x2b8] sm:$0xff]  }
 0x257   : > { %4641 = vmatprep.subr.bf16.mxu1 %v5426_v0  ;;  %4661 = vmatprep.subr.bf16.mxu0 %v5426_v0 }
 0x259   : > { %4618 = vmatmul.mubr.bf16.vlgmr.msra.gmra.mxu1 %v1215_v31  ;;  %4638 = vmatmul.mubr.bf16.vlgmr.msra.gmra.mxu0 %v1215_v31  ;;  %v5201_v31 = vld [vmem:[#allocation2 + $0x378] sm:$0xff]  }
 0x25a   : > { %4657 = vmatprep.mubr.msk.bf16.mxu1 %vm5427_vm0, %v5426_v0  ;;  %4677 = vmatprep.mubr.msk.bf16.mxu0 %vm5427_vm0, %v5426_v0 }
 0x25b   : > { %4642 = vmatpush3.bf16.msra.mxu1 %v5184_v32  ;;  %4662 = vmatpush3.bf16.msra.mxu0 %v5185_v33  ;;  %v5202_v33 = vld [vmem:[#allocation2 + $0x2b0] sm:$0xff]  }
 0x25c   : > { %4643 = vmatprep.subr.bf16.mxu1 %v5426_v0  ;;  %4663 = vmatprep.subr.bf16.mxu0 %v5426_v0 }
 0x25f   : > { %4644 = vmatpush3.bf16.msra.mxu1 %v5186_v34  ;;  %4664 = vmatpush3.bf16.msra.mxu0 %v5187_v35  ;;  %v5203_v34 = vld [vmem:[#allocation2 + $0x370] sm:$0xff]   ;;  %v5204_v35 = vld [vmem:[#allocation2 + $0x2a8] sm:$0xff]  }
 0x260   : > { %4645 = vmatprep.subr.bf16.mxu1 %v5426_v0  ;;  %4665 = vmatprep.subr.bf16.mxu0 %v5426_v0 }
 0x263   : > { %4646 = vmatpush3.bf16.msra.mxu1 %v5188_v36  ;;  %4666 = vmatpush3.bf16.msra.mxu0 %v5189_v37  ;;  %v5205_v36 = vld [vmem:[#allocation2 + $0x368] sm:$0xff]   ;;  %v5206_v37 = vld [vmem:[#allocation2 + $0x2a0] sm:$0xff]  }
 0x264   : > { %4647 = vmatprep.subr.bf16.mxu1 %v5426_v0  ;;  %4667 = vmatprep.subr.bf16.mxu0 %v5426_v0 }
 0x267   : > { %4648 = vmatpush3.bf16.msra.mxu1 %v5190_v38  ;;  %4668 = vmatpush3.bf16.msra.mxu0 %v5191_v39  ;;  %v5207_v38 = vld [vmem:[#allocation2 + $0x360] sm:$0xff]   ;;  %v5208_v39 = vld [vmem:[#allocation2 + $0x298] sm:$0xff]  }
 0x268   : > { %4649 = vmatprep.subr.bf16.mxu1 %v5426_v0  ;;  %4669 = vmatprep.subr.bf16.mxu0 %v5426_v0 }
 0x26b   : > { %4650 = vmatpush3.bf16.msra.mxu1 %v5192_v40  ;;  %4670 = vmatpush3.bf16.msra.mxu0 %v5193_v41  ;;  %v5209_v40 = vld [vmem:[#allocation2 + $0x358] sm:$0xff]   ;;  %v5210_v41 = vld [vmem:[#allocation2 + $0x290] sm:$0xff]  }
 0x26c   : > { %4651 = vmatprep.subr.bf16.mxu1 %v5426_v0  ;;  %4671 = vmatprep.subr.bf16.mxu0 %v5426_v0 }
 0x26f   : > { %4652 = vmatpush3.bf16.msra.mxu1 %v5194_v42  ;;  %4672 = vmatpush3.bf16.msra.mxu0 %v5195_v43  ;;  %v5211_v42 = vld [vmem:[#allocation2 + $0x350] sm:$0xff]   ;;  %v5212_v43 = vld [vmem:[#allocation2 + $0x288] sm:$0xff]  }
 0x270   : > { %4653 = vmatprep.subr.bf16.mxu1 %v5426_v0  ;;  %4673 = vmatprep.subr.bf16.mxu0 %v5426_v0 }
 0x273   : > { %4654 = vmatpush3.bf16.msra.mxu1 %v5196_v44  ;;  %4674 = vmatpush3.bf16.msra.mxu0 %v5197_v45  ;;  %v5213_v44 = vld [vmem:[#allocation2 + $0x348] sm:$0xff]   ;;  %v5214_v45 = vld [vmem:[#allocation2 + $0x280] sm:$0xff]  }
 0x274   : > { %4655 = vmatprep.subr.bf16.mxu1 %v5426_v0  ;;  %4675 = vmatprep.subr.bf16.mxu0 %v5426_v0 }
 0x277   : > { %4656 = vmatpush3.bf16.msra.mxu1 %v5198_v46  ;;  %4676 = vmatpush3.bf16.msra.mxu0 %v5199_v47  ;;  %v5215_v46 = vld [vmem:[#allocation2 + $0x340] sm:$0xff]   ;;  %v5216_v47 = vld [vmem:[#allocation2 + $0x338] sm:$0xff]  }
 0x278   : > { %4681 = vmatprep.subr.bf16.mxu1 %v5426_v0  ;;  %4701 = vmatprep.subr.bf16.mxu0 %v5426_v0 }
 0x2d9   : > { %v912_v48 = vpop.f32.mrf.mxu1  ;;  %v1000_v49 = vpop.f32.mrf.mxu0 }
 0x2db   : > { %v4539_v50 = vpop.f32.mrf.mxu1  ;;  %v4559_v51 = vpop.f32.mrf.mxu0 }
 0x2dc   : > { %v5219_v50 = vld [vmem:[#allocation2 + $0x3f0] sm:$0xff]   ;;  %v5220_v51 = vld [vmem:[#allocation2 + $0x328] sm:$0xff]  }
 0x2dd   : > { %v915_v52 = vpop.f32.mrf.mxu1  ;;  %v1003_v53 = vpop.f32.mrf.mxu0 }
 0x2de   : > { %v5221_v52 = vld [vmem:[#allocation2 + $0x3e8] sm:$0xff]   ;;  %v5222_v53 = vld [vmem:[#allocation2 + $0x320] sm:$0xff]  }
 0x2df   : > { %v4540_v54 = vpop.f32.mrf.mxu1  ;;  %v4560_v55 = vpop.f32.mrf.mxu0 }
 0x2e0   : > { %v5223_v54 = vld [vmem:[#allocation2 + $0x3e0] sm:$0xff]   ;;  %v5224_v55 = vld [vmem:[#allocation2 + $0x318] sm:$0xff]  }
 0x2f9   : > { %v1088_v56 = vpop.f32.mrf.mxu1  ;;  %v1176_v57 = vpop.f32.mrf.mxu0 }
 0x2fa   : > { %v1177_v2 = vadd.f32 %v1176_v57, %v1000_v49  ;;  %v1089_v20 = vadd.f32 %v1088_v56, %v912_v48  ;;  %v5217_v48 = vld [vmem:[#allocation2 + $0x3f8] sm:$0xff]   ;;  %v5218_v49 = vld [vmem:[#allocation2 + $0x330] sm:$0xff]  }
 0x2fb   : > { %v4579_v58 = vpop.f32.mrf.mxu1  ;;  %v4599_v59 = vpop.f32.mrf.mxu0  ;;  %v5225_v56 = vld [vmem:[#allocation2 + $0x3d8] sm:$0xff]   ;;  %v5226_v57 = vld [vmem:[#allocation2 + $0x310] sm:$0xff]  }
 0x2fc   : > { %v5227_v58 = vld [vmem:[#allocation2 + $0x3d0] sm:$0xff]   ;;  %v5228_v59 = vld [vmem:[#allocation2 + $0x308] sm:$0xff]  }
 0x2fd   : > { %v1091_v60 = vpop.f32.mrf.mxu1  ;;  %v1179_v61 = vpop.f32.mrf.mxu0 }
 0x2fe   : > { %v5229_v60 = vld [vmem:[#allocation2 + $0x3c8] sm:$0xff]   ;;  %v5230_v61 = vld [vmem:[#allocation2 + $0x300] sm:$0xff]  }
 0x2ff   : > { %v4580_v62 = vpop.f32.mrf.mxu1  ;;  %v4600_v63 = vpop.f32.mrf.mxu0 }
 0x300   : > { %v5231_v62 = vld [vmem:[#allocation2 + $0x3c0] sm:$0xff]  }
 0x319   : > { %v1299_v4 = vpop.f32.mrf.mxu1  ;;  %v1387_v5 = vpop.f32.mrf.mxu0 }
 0x31a   : > { %v1394_v6 = vadd.f32 %v1387_v5, %v1177_v2  ;;  %v1393_v21 = vadd.f32 %v1299_v4, %v1089_v20  ;;  %v5233_v2 = vld [vmem:[#allocation2 + $0x430] sm:$0xff]   ;;  %v5235_v4 = vld [vmem:[#allocation2 + $0x420] sm:$0xff]   ;;  %v5236_v5 = vld [vmem:[#allocation2 + $0x418] sm:$0xff]  }
 0x31b   : > { %v4619_v8 = vpop.f32.mrf.mxu1  ;;  %v4639_v9 = vpop.f32.mrf.mxu0 }
 0x31c   : > { %v1404_v11 = vadd.f32 %v1403_v3, %v1394_v6  ;;  %v1399_v23 = vadd.f32 %v1398_v22, %v1393_v21  ;;  %v5234_v3 = vld [vmem:[#allocation2 + $0x428] sm:$0xff]   ;;  %v5237_v6 = vld [vmem:[#allocation2 + $0x410] sm:$0xff]   ;;  %v5239_v9 = vld [vmem:[#allocation2 + $0x400] sm:$0xff]  }
 0x31d   : > { %v1302_v12 = vpop.f32.mrf.mxu1  ;;  %v1390_v13 = vpop.f32.mrf.mxu0  ;;  %v5238_v8 = vld [vmem:[#allocation2 + $0x408] sm:$0xff]  }
 0x31e   : > { %v3950_v14 = vmul.f32 -1.442695, %v1404_v11  ;;  %v5240_v11 = vld [vmem:[#allocation2 + $0x4b8] sm:$0xff]   ;;  %v5242_v12 = vld [vmem:[#allocation2 + $0x4b0] sm:$0xff]   ;;  %v5244_v13 = vld [vmem:[#allocation2 + $0x4a8] sm:$0xff]  }
 0x31f   : > { %v4620_v15 = vpop.f32.mrf.mxu1  ;;  %v4640_v16 = vpop.f32.mrf.mxu0 }
 0x320   : > { %5368 = vpow2.f32 %v3950_v14  ;;  %v5246_v14 = vld [vmem:[#allocation2 + $0x4a0] sm:$0xff]   ;;  %v5248_v15 = vld [vmem:[#allocation2 + $0x498] sm:$0xff]   ;;  %v5250_v16 = vld [vmem:[#allocation2 + $0x490] sm:$0xff]  }
 0x32d   : > { %v5369_v17 = vpop.eup %5368 }
 0x32e   : > { %v1408_v18 = vadd.f32 1.0, %v5369_v17 }
 0x330   : > { %5370 = vrcp.f32 %v1408_v18 }
 0x33d   : > { %v5371_v24 = vpop.eup %5370 }
 0x33e   : > { %v1411_v25 = vmul.f32 %v5371_v24, %v1399_v23 }
 0x340   : > { %v5639_v26 = vpack.c.bf16 %v1411_v25, %v1411_v25 }
 0x342   : > { %v1480_v27 = vshll.u32 %v5639_v26, 16  ;;  %v1478_v28 = vshrl.u32 %v5639_v26, 16  ;;  %v1870_v63 = vrot.slane %v5639_v26, 1 }
 0x344   : > { %v1482_v29 = vrot.slane %v1480_v27, 1 }
 0x346   : > { %v1483_v32 = vor.u32 %v1482_v29, %v1478_v28 }
 0x348   : > { %4658 = vmatmul.mubr.bf16.vlgmr.msra.gmra.mxu1 %v1483_v32  ;;  %4678 = vmatmul.mubr.bf16.vlgmr.msra.gmra.mxu0 %v1483_v32 }
 0x349   : > { %4682 = vmatpush3.bf16.msra.mxu1 %v5200_v30  ;;  %4702 = vmatpush3.bf16.msra.mxu0 %v5201_v31 }
 0x34a   : > { %4683 = vmatprep.subr.bf16.mxu1 %v5426_v0  ;;  %4703 = vmatprep.subr.bf16.mxu0 %v5426_v0 }
 0x34b   : > { %4697 = vmatprep.mubr.msk.bf16.mxu1 %vm5427_vm0, %v5426_v0  ;;  %4717 = vmatprep.mubr.msk.bf16.mxu0 %vm5427_vm0, %v5426_v0 }
 0x34d   : > { %4684 = vmatpush3.bf16.msra.mxu1 %v5202_v33  ;;  %4704 = vmatpush3.bf16.msra.mxu0 %v5203_v34  ;;  %v2057_v33 = vsub.s32 5, %v5547_v7 }
 0x34e   : > { %4685 = vmatprep.subr.bf16.mxu1 %v5426_v0  ;;  %4705 = vmatprep.subr.bf16.mxu0 %v5426_v0 }
 0x351   : > { %4686 = vmatpush3.bf16.msra.mxu1 %v5204_v35  ;;  %4706 = vmatpush3.bf16.msra.mxu0 %v5205_v36  ;;  %v2058_v35 = vrot.slane %v5550_v10, %v2057_v33  ;;  %v5273_v33 = vld [vmem:[#allocation2 + $0x5b8] sm:$0xff]  }
 0x352   : > { %4687 = vmatprep.subr.bf16.mxu1 %v5426_v0  ;;  %4707 = vmatprep.subr.bf16.mxu0 %v5426_v0 }
 0x355   : > { %4688 = vmatpush3.bf16.msra.mxu1 %v5206_v37  ;;  %4708 = vmatpush3.bf16.msra.mxu0 %v5207_v38 }
 0x356   : > { %4689 = vmatprep.subr.bf16.mxu1 %v5426_v0  ;;  %4709 = vmatprep.subr.bf16.mxu0 %v5426_v0 }
 0x359   : > { %4690 = vmatpush3.bf16.msra.mxu1 %v5208_v39  ;;  %4710 = vmatpush3.bf16.msra.mxu0 %v5209_v40 }
 0x35a   : > { %4691 = vmatprep.subr.bf16.mxu1 %v5426_v0  ;;  %4711 = vmatprep.subr.bf16.mxu0 %v5426_v0 }
 0x35d   : > { %4692 = vmatpush3.bf16.msra.mxu1 %v5210_v41  ;;  %4712 = vmatpush3.bf16.msra.mxu0 %v5211_v42 }
 0x35e   : > { %4693 = vmatprep.subr.bf16.mxu1 %v5426_v0  ;;  %4713 = vmatprep.subr.bf16.mxu0 %v5426_v0 }
 0x361   : > { %4694 = vmatpush3.bf16.msra.mxu1 %v5212_v43  ;;  %4714 = vmatpush3.bf16.msra.mxu0 %v5213_v44 }
 0x362   : > { %4695 = vmatprep.subr.bf16.mxu1 %v5426_v0  ;;  %4715 = vmatprep.subr.bf16.mxu0 %v5426_v0 }
 0x365   : > { %4696 = vmatpush3.bf16.msra.mxu1 %v5214_v45  ;;  %4716 = vmatpush3.bf16.msra.mxu0 %v5215_v46 }
 0x366   : > { %4721 = vmatprep.subr.bf16.mxu1 %v5426_v0  ;;  %4741 = vmatprep.subr.bf16.mxu0 %v5426_v0 }
 0x368   : > { %4698 = vmatmul.mubr.bf16.vlgmr.msra.gmra.mxu1 %v5639_v26  ;;  %4718 = vmatmul.mubr.bf16.vlgmr.msra.gmra.mxu0 %v5639_v26 }
 0x369   : > { %4722 = vmatpush3.bf16.msra.mxu1 %v5216_v47  ;;  %4742 = vmatpush3.bf16.msra.mxu0 %v5217_v48 }
 0x36a   : > { %4723 = vmatprep.subr.bf16.mxu1 %v5426_v0  ;;  %4743 = vmatprep.subr.bf16.mxu0 %v5426_v0 }
 0x36b   : > { %4737 = vmatprep.mubr.msk.bf16.mxu1 %vm5427_vm0, %v5426_v0  ;;  %4757 = vmatprep.mubr.msk.bf16.mxu0 %vm5427_vm0, %v5426_v0 }
 0x36d   : > { %4724 = vmatpush3.bf16.msra.mxu1 %v5218_v49  ;;  %4744 = vmatpush3.bf16.msra.mxu0 %v5219_v50  ;;  %v2052_v49 = vsub.s32 4, %v5547_v7 }
 0x36e   : > { %4725 = vmatprep.subr.bf16.mxu1 %v5426_v0  ;;  %4745 = vmatprep.subr.bf16.mxu0 %v5426_v0 }
 0x371   : > { %4726 = vmatpush3.bf16.msra.mxu1 %v5220_v51  ;;  %4746 = vmatpush3.bf16.msra.mxu0 %v5221_v52  ;;  %v2053_v52 = vrot.slane %v5550_v10, %v2052_v49  ;;  %v5288_v49 = vld [vmem:[#allocation2 + $0x638] sm:$0xff]  }
 0x372   : > { %4727 = vmatprep.subr.bf16.mxu1 %v5426_v0  ;;  %4747 = vmatprep.subr.bf16.mxu0 %v5426_v0 }
 0x375   : > { %4728 = vmatpush3.bf16.msra.mxu1 %v5222_v53  ;;  %4748 = vmatpush3.bf16.msra.mxu0 %v5223_v54 }
 0x376   : > { %4729 = vmatprep.subr.bf16.mxu1 %v5426_v0  ;;  %4749 = vmatprep.subr.bf16.mxu0 %v5426_v0 }
 0x379   : > { %4730 = vmatpush3.bf16.msra.mxu1 %v5224_v55  ;;  %4750 = vmatpush3.bf16.msra.mxu0 %v5225_v56  ;;  %v5241_v56 = vld [vmem:[#allocation2 + $0x578] sm:$0xff]  }
 0x37a   : > { %4731 = vmatprep.subr.bf16.mxu1 %v5426_v0  ;;  %4751 = vmatprep.subr.bf16.mxu0 %v5426_v0 }
 0x37d   : > { %4732 = vmatpush3.bf16.msra.mxu1 %v5226_v57  ;;  %4752 = vmatpush3.bf16.msra.mxu0 %v5227_v58  ;;  %v5243_v58 = vld [vmem:[#allocation2 + $0x570] sm:$0xff]  }
 0x37e   : > { %4733 = vmatprep.subr.bf16.mxu1 %v5426_v0  ;;  %4753 = vmatprep.subr.bf16.mxu0 %v5426_v0 }
 0x381   : > { %4734 = vmatpush3.bf16.msra.mxu1 %v5228_v59  ;;  %4754 = vmatpush3.bf16.msra.mxu0 %v5229_v60  ;;  %v5245_v59 = vld [vmem:[#allocation2 + $0x568] sm:$0xff]   ;;  %v5247_v60 = vld [vmem:[#allocation2 + $0x560] sm:$0xff]  }
 0x382   : > { %4735 = vmatprep.subr.bf16.mxu1 %v5426_v0  ;;  %4755 = vmatprep.subr.bf16.mxu0 %v5426_v0 }
 0x385   : > { %4736 = vmatpush3.bf16.msra.mxu1 %v5230_v61  ;;  %4756 = vmatpush3.bf16.msra.mxu0 %v5231_v62  ;;  %v5249_v61 = vld [vmem:[#allocation2 + $0x558] sm:$0xff]   ;;  %v5251_v62 = vld [vmem:[#allocation2 + $0x550] sm:$0xff]  }
 0x386   : > { %4761 = vmatprep.subr.bf16.mxu1 %v5426_v0  ;;  %4781 = vmatprep.subr.bf16.mxu0 %v5426_v0 }
 0x388   : > { %4738 = vmatmul.mubr.bf16.vlgmr.msra.gmra.mxu1 %v1870_v63  ;;  %4758 = vmatmul.mubr.bf16.vlgmr.msra.gmra.mxu0 %v1870_v63  ;;  %v5252_v63 = vld [vmem:[#allocation2 + $0x488] sm:$0xff]  }
 0x389   : > { %4777 = vmatprep.mubr.msk.bf16.mxu1 %vm5427_vm0, %v5426_v0  ;;  %4797 = vmatprep.mubr.msk.bf16.mxu0 %vm5427_vm0, %v5426_v0 }
 0x38a   : > { %4762 = vmatpush3.bf16.msra.mxu1 %v5232_v1  ;;  %4782 = vmatpush3.bf16.msra.mxu0 %v5240_v11  ;;  %v5253_v1 = vld [vmem:[#allocation2 + $0x548] sm:$0xff]  }
 0x38b   : > { %4763 = vmatprep.subr.bf16.mxu1 %v5426_v0  ;;  %4783 = vmatprep.subr.bf16.mxu0 %v5426_v0 }
 0x38e   : > { %4764 = vmatpush3.bf16.msra.mxu1 %v5233_v2  ;;  %4784 = vmatpush3.bf16.msra.mxu0 %v5242_v12  ;;  %v5254_v2 = vld [vmem:[#allocation2 + $0x480] sm:$0xff]  }
 0x38f   : > { %4765 = vmatprep.subr.bf16.mxu1 %v5426_v0  ;;  %4785 = vmatprep.subr.bf16.mxu0 %v5426_v0 }
 0x392   : > { %4766 = vmatpush3.bf16.msra.mxu1 %v5234_v3  ;;  %4786 = vmatpush3.bf16.msra.mxu0 %v5244_v13  ;;  %v5255_v3 = vld [vmem:[#allocation2 + $0x540] sm:$0xff]  }
 0x393   : > { %4767 = vmatprep.subr.bf16.mxu1 %v5426_v0  ;;  %4787 = vmatprep.subr.bf16.mxu0 %v5426_v0 }
 0x396   : > { %4768 = vmatpush3.bf16.msra.mxu1 %v5235_v4  ;;  %4788 = vmatpush3.bf16.msra.mxu0 %v5246_v14 }
 0x397   : > { %4769 = vmatprep.subr.bf16.mxu1 %v5426_v0  ;;  %4789 = vmatprep.subr.bf16.mxu0 %v5426_v0 }
 0x39a   : > { %4770 = vmatpush3.bf16.msra.mxu1 %v5236_v5  ;;  %4790 = vmatpush3.bf16.msra.mxu0 %v5248_v15  ;;  %v5256_v15 = vld [vmem:[#allocation2 + $0x478] sm:$0xff]  }
 0x39b   : > { %4771 = vmatprep.subr.bf16.mxu1 %v5426_v0  ;;  %4791 = vmatprep.subr.bf16.mxu0 %v5426_v0 }
 0x39e   : > { %4772 = vmatpush3.bf16.msra.mxu1 %v5237_v6  ;;  %4792 = vmatpush3.bf16.msra.mxu0 %v5250_v16  ;;  %v5257_v16 = vld [vmem:[#allocation2 + $0x538] sm:$0xff]  }
 0x39f   : > { %4773 = vmatprep.subr.bf16.mxu1 %v5426_v0  ;;  %4793 = vmatprep.subr.bf16.mxu0 %v5426_v0 }
 0x3a2   : > { %4774 = vmatpush3.bf16.msra.mxu1 %v5238_v8  ;;  %4794 = vmatpush3.bf16.msra.mxu0 %v5252_v63  ;;  %v5302_v63 = vld [vmem:[#allocation2 + $0x600] sm:$0xff]  }
 0x3a3   : > { %4775 = vmatprep.subr.bf16.mxu1 %v5426_v0  ;;  %4795 = vmatprep.subr.bf16.mxu0 %v5426_v0 }
 0x3a6   : > { %4776 = vmatpush3.bf16.msra.mxu1 %v5239_v9  ;;  %4796 = vmatpush3.bf16.msra.mxu0 %v5254_v2 }
 0x3a7   : > { %4801 = vmatprep.subr.bf16.mxu1 %v5426_v0  ;;  %4821 = vmatprep.subr.bf16.mxu0 %v5426_v0 }
 0x408   : > { %v1567_v17 = vpop.f32.mrf.mxu1  ;;  %v1655_v18 = vpop.f32.mrf.mxu0 }
 0x40a   : > { %v4659_v19 = vpop.f32.mrf.mxu1  ;;  %v4679_v20 = vpop.f32.mrf.mxu0 }
 0x40b   : > { %v5259_v19 = vld [vmem:[#allocation2 + $0x530] sm:$0xff]   ;;  %v5260_v20 = vld [vmem:[#allocation2 + $0x468] sm:$0xff]  }
 0x40c   : > { %v1570_v21 = vpop.f32.mrf.mxu1  ;;  %v1658_v22 = vpop.f32.mrf.mxu0 }
 0x40d   : > { %v5261_v21 = vld [vmem:[#allocation2 + $0x528] sm:$0xff]   ;;  %v5262_v22 = vld [vmem:[#allocation2 + $0x460] sm:$0xff]  }
 0x40e   : > { %v4660_v23 = vpop.f32.mrf.mxu1  ;;  %v4680_v24 = vpop.f32.mrf.mxu0 }
 0x40f   : > { %v5263_v23 = vld [vmem:[#allocation2 + $0x520] sm:$0xff]   ;;  %v5264_v24 = vld [vmem:[#allocation2 + $0x458] sm:$0xff]  }
 0x428   : > { %v1743_v25 = vpop.f32.mrf.mxu1  ;;  %v1831_v26 = vpop.f32.mrf.mxu0 }
 0x429   : > { %v1832_v34 = vadd.f32 %v1831_v26, %v1655_v18  ;;  %v1744_v50 = vadd.f32 %v1743_v25, %v1567_v17  ;;  %v5258_v18 = vld [vmem:[#allocation2 + $0x470] sm:$0xff]   ;;  %v5265_v25 = vld [vmem:[#allocation2 + $0x518] sm:$0xff]  }
 0x42a   : > { %v4699_v27 = vpop.f32.mrf.mxu1  ;;  %v4719_v28 = vpop.f32.mrf.mxu0  ;;  %v5266_v26 = vld [vmem:[#allocation2 + $0x450] sm:$0xff]  }
 0x42b   : > { %v5267_v27 = vld [vmem:[#allocation2 + $0x510] sm:$0xff]   ;;  %v5268_v28 = vld [vmem:[#allocation2 + $0x448] sm:$0xff]  }
 0x42c   : > { %v1746_v29 = vpop.f32.mrf.mxu1  ;;  %v1834_v30 = vpop.f32.mrf.mxu0 }
 0x42d   : > { %v5269_v29 = vld [vmem:[#allocation2 + $0x508] sm:$0xff]   ;;  %v5270_v30 = vld [vmem:[#allocation2 + $0x440] sm:$0xff]  }
 0x42e   : > { %v4700_v31 = vpop.f32.mrf.mxu1  ;;  %v4720_v32 = vpop.f32.mrf.mxu0 }
 0x42f   : > { %v5271_v31 = vld [vmem:[#allocation2 + $0x500] sm:$0xff]   ;;  %v5272_v32 = vld [vmem:[#allocation2 + $0x4f8] sm:$0xff]  }
 0x448   : > { %v1954_v36 = vpop.f32.mrf.mxu1  ;;  %v2042_v37 = vpop.f32.mrf.mxu0 }
 0x449   : > { %v2049_v38 = vadd.f32 %v2042_v37, %v1832_v34  ;;  %v2048_v51 = vadd.f32 %v1954_v36, %v1744_v50  ;;  %v5274_v34 = vld [vmem:[#allocation2 + $0x4f0] sm:$0xff]   ;;  %v5276_v36 = vld [vmem:[#allocation2 + $0x4e8] sm:$0xff]   ;;  %v5289_v50 = vld [vmem:[#allocation2 + $0x738] sm:$0xff]  }
 0x44a   : > { %v4739_v39 = vpop.f32.mrf.mxu1  ;;  %v4759_v40 = vpop.f32.mrf.mxu0  ;;  %v5277_v37 = vld [vmem:[#allocation2 + $0x5a8] sm:$0xff]  }
 0x44b   : > { %v2059_v41 = vadd.f32 %v2058_v35, %v2049_v38  ;;  %v2054_v53 = vadd.f32 %v2053_v52, %v2048_v51  ;;  %v5275_v35 = vld [vmem:[#allocation2 + $0x5b0] sm:$0xff]   ;;  %v5278_v38 = vld [vmem:[#allocation2 + $0x4e0] sm:$0xff]   ;;  %v5280_v40 = vld [vmem:[#allocation2 + $0x4d8] sm:$0xff]  }
 0x44c   : > { %v1957_v42 = vpop.f32.mrf.mxu1  ;;  %v2045_v43 = vpop.f32.mrf.mxu0  ;;  %v5279_v39 = vld [vmem:[#allocation2 + $0x5a0] sm:$0xff]   ;;  %v5290_v51 = vld [vmem:[#allocation2 + $0x630] sm:$0xff]  }
 0x44d   : > { %v3999_v44 = vmul.f32 -1.442695, %v2059_v41  ;;  %v5281_v41 = vld [vmem:[#allocation2 + $0x598] sm:$0xff]   ;;  %v5282_v42 = vld [vmem:[#allocation2 + $0x4d0] sm:$0xff]  }
 0x44e   : > { %v4740_v45 = vpop.f32.mrf.mxu1  ;;  %v4760_v46 = vpop.f32.mrf.mxu0  ;;  %v5283_v43 = vld [vmem:[#allocation2 + $0x590] sm:$0xff]  }
 0x44f   : > { %5372 = vpow2.f32 %v3999_v44  ;;  %v5284_v44 = vld [vmem:[#allocation2 + $0x4c8] sm:$0xff]   ;;  %v5286_v46 = vld [vmem:[#allocation2 + $0x4c0] sm:$0xff]   ;;  %v5291_v52 = vld [vmem:[#allocation2 + $0x730] sm:$0xff]  }
 0x450   : > { %v5285_v45 = vld [vmem:[#allocation2 + $0x588] sm:$0xff]  }
 0x45c   : > { %v5373_v47 = vpop.eup %5372 }
 0x45d   : > { %v2063_v48 = vadd.f32 1.0, %v5373_v47  ;;  %v5287_v47 = vld [vmem:[#allocation2 + $0x580] sm:$0xff]  }
 0x45f   : > { %5374 = vrcp.f32 %v2063_v48 }
 0x46c   : > { %v5375_v54 = vpop.eup %5374 }
 0x46d   : > { %v2066_v55 = vmul.f32 %v5375_v54, %v2054_v53  ;;  %v5292_v53 = vld [vmem:[#allocation2 + $0x628] sm:$0xff]  }
 0x46e   : > { %v5293_v54 = vld [vmem:[#allocation2 + $0x728] sm:$0xff]  }
 0x46f   : > { %v2083_v57 = vpack.c.bf16 %v2066_v55, %v2066_v55  ;;  %v5294_v55 = vld [vmem:[#allocation2 + $0x620] sm:$0xff]  }
 0x471   : > { %4778 = vmatmul.mubr.bf16.vlgmr.msra.gmra.mxu1 %v2083_v57  ;;  %v5296_v57 = vld [vmem:[#allocation2 + $0x618] sm:$0xff]  }
 0x472   : > { %4802 = vmatpush3.bf16.msra.mxu1 %v5241_v56  ;;  %4817 = vmatprep.mubr.msk.bf16.mxu1 %vm5427_vm0, %v5426_v0  ;;  %v5295_v56 = vld [vmem:[#allocation2 + $0x720] sm:$0xff]  }
 0x473   : > { %4803 = vmatprep.subr.bf16.mxu1 %v5426_v0 }
 0x476   : > { %4804 = vmatpush3.bf16.msra.mxu1 %v5243_v58  ;;  %v5297_v58 = vld [vmem:[#allocation2 + $0x718] sm:$0xff]  }
 0x477   : > { %4805 = vmatprep.subr.bf16.mxu1 %v5426_v0 }
 0x47a   : > { %4806 = vmatpush3.bf16.msra.mxu1 %v5245_v59  ;;  %v5298_v59 = vld [vmem:[#allocation2 + $0x610] sm:$0xff]  }
 0x47b   : > { %4807 = vmatprep.subr.bf16.mxu1 %v5426_v0 }
 0x47e   : > { %4808 = vmatpush3.bf16.msra.mxu1 %v5247_v60  ;;  %v5299_v60 = vld [vmem:[#allocation2 + $0x710] sm:$0xff]  }
 0x47f   : > { %4809 = vmatprep.subr.bf16.mxu1 %v5426_v0 }
 0x482   : > { %4810 = vmatpush3.bf16.msra.mxu1 %v5249_v61  ;;  %v5300_v61 = vld [vmem:[#allocation2 + $0x608] sm:$0xff]  }
 0x483   : > { %4811 = vmatprep.subr.bf16.mxu1 %v5426_v0 }
 0x486   : > { %4812 = vmatpush3.bf16.msra.mxu1 %v5251_v62  ;;  %v5301_v62 = vld [vmem:[#allocation2 + $0x708] sm:$0xff]  }
 0x487   : > { %4813 = vmatprep.subr.bf16.mxu1 %v5426_v0 }
 0x48a   : > { %4814 = vmatpush3.bf16.msra.mxu1 %v5253_v1  ;;  %v5303_v1 = vld [vmem:[#allocation2 + $0x700] sm:$0xff]  }
 0x48b   : > { %4815 = vmatprep.subr.bf16.mxu1 %v5426_v0 }
 0x48e   : > { %4816 = vmatpush3.bf16.msra.mxu1 %v5255_v3 }
 0x48f   : > { %4841 = vmatprep.subr.bf16.mxu1 %v5426_v0 }
 0x531   : > { %v2166_v4 = vpop.f32.mrf.mxu1 }
 0x532   : > { %v2172_v5 = vmax.f32 %v2166_v4, 0.0 }
 0x533   : > { %v4779_v6 = vpop.f32.mrf.mxu1 }
 0x534   : > { %v5720_v8 = vpack.c.bf16 %v2172_v5, %v2172_v5 }
 0x535   : > { %v2169_v9 = vpop.f32.mrf.mxu1 }
 0x536   : > { %v2241_v11 = vshll.u32 %v5720_v8, 16  ;;  %v2239_v13 = vshrl.u32 %v5720_v8, 16  ;;  %v2631_v48 = vrot.slane %v5720_v8, 1 }
 0x537   : > { %v4780_v12 = vpop.f32.mrf.mxu1 }
 0x538   : > { %v2243_v14 = vrot.slane %v2241_v11, 1 }
 0x53a   : > { %v2244_v17 = vor.u32 %v2243_v14, %v2239_v13 }
 0x53c   : > { %4798 = vmatmul.mubr.bf16.vlgmr.msra.gmra.mxu0 %v2244_v17  ;;  %4818 = vmatmul.mubr.bf16.vlgmr.msra.gmra.mxu1 %v2244_v17 }
 0x53d   : > { %4822 = vmatpush3.bf16.msra.mxu0 %v5256_v15  ;;  %4842 = vmatpush3.bf16.msra.mxu1 %v5257_v16 }
 0x53e   : > { %4823 = vmatprep.subr.bf16.mxu0 %v5426_v0  ;;  %4843 = vmatprep.subr.bf16.mxu1 %v5426_v0 }
 0x53f   : > { %4837 = vmatprep.mubr.msk.bf16.mxu0 %vm5427_vm0, %v5426_v0  ;;  %4857 = vmatprep.mubr.msk.bf16.mxu1 %vm5427_vm0, %v5426_v0 }
 0x541   : > { %4824 = vmatpush3.bf16.msra.mxu0 %v5258_v18  ;;  %4844 = vmatpush3.bf16.msra.mxu1 %v5259_v19 }
 0x542   : > { %4825 = vmatprep.subr.bf16.mxu0 %v5426_v0  ;;  %4845 = vmatprep.subr.bf16.mxu1 %v5426_v0 }
 0x545   : > { %4826 = vmatpush3.bf16.msra.mxu0 %v5260_v20  ;;  %4846 = vmatpush3.bf16.msra.mxu1 %v5261_v21  ;;  %v2818_v20 = vsub.s32 7, %v5547_v7 }
 0x546   : > { %4827 = vmatprep.subr.bf16.mxu0 %v5426_v0  ;;  %4847 = vmatprep.subr.bf16.mxu1 %v5426_v0 }
 0x549   : > { %4828 = vmatpush3.bf16.msra.mxu0 %v5262_v22  ;;  %4848 = vmatpush3.bf16.msra.mxu1 %v5263_v23  ;;  %v2819_v22 = vrot.slane %v5550_v10, %v2818_v20  ;;  %v5341_v20 = vld [vmem:[#allocation2 + $0x7a8] sm:$0xff]  }
 0x54a   : > { %4829 = vmatprep.subr.bf16.mxu0 %v5426_v0  ;;  %4849 = vmatprep.subr.bf16.mxu1 %v5426_v0 }
 0x54d   : > { %4830 = vmatpush3.bf16.msra.mxu0 %v5264_v24  ;;  %4850 = vmatpush3.bf16.msra.mxu1 %v5265_v25 }
 0x54e   : > { %4831 = vmatprep.subr.bf16.mxu0 %v5426_v0  ;;  %4851 = vmatprep.subr.bf16.mxu1 %v5426_v0 }
 0x551   : > { %4832 = vmatpush3.bf16.msra.mxu0 %v5266_v26  ;;  %4852 = vmatpush3.bf16.msra.mxu1 %v5267_v27 }
 0x552   : > { %4833 = vmatprep.subr.bf16.mxu0 %v5426_v0  ;;  %4853 = vmatprep.subr.bf16.mxu1 %v5426_v0 }
 0x555   : > { %4834 = vmatpush3.bf16.msra.mxu0 %v5268_v28  ;;  %4854 = vmatpush3.bf16.msra.mxu1 %v5269_v29 }
 0x556   : > { %4835 = vmatprep.subr.bf16.mxu0 %v5426_v0  ;;  %4855 = vmatprep.subr.bf16.mxu1 %v5426_v0 }
 0x559   : > { %4836 = vmatpush3.bf16.msra.mxu0 %v5270_v30  ;;  %4856 = vmatpush3.bf16.msra.mxu1 %v5271_v31 }
 0x55a   : > { %4861 = vmatprep.subr.bf16.mxu0 %v5426_v0  ;;  %4881 = vmatprep.subr.bf16.mxu1 %v5426_v0 }
 0x55c   : > { %4838 = vmatmul.mubr.bf16.vlgmr.msra.gmra.mxu0 %v5720_v8  ;;  %4858 = vmatmul.mubr.bf16.vlgmr.msra.gmra.mxu1 %v5720_v8 }
 0x55d   : > { %4862 = vmatpush3.bf16.msra.mxu0 %v5272_v32  ;;  %4882 = vmatpush3.bf16.msra.mxu1 %v5273_v33 }
 0x55e   : > { %4863 = vmatprep.subr.bf16.mxu0 %v5426_v0  ;;  %4883 = vmatprep.subr.bf16.mxu1 %v5426_v0 }
 0x55f   : > { %4877 = vmatprep.mubr.msk.bf16.mxu0 %vm5427_vm0, %v5426_v0  ;;  %4897 = vmatprep.mubr.msk.bf16.mxu1 %vm5427_vm0, %v5426_v0 }
 0x561   : > { %4864 = vmatpush3.bf16.msra.mxu0 %v5274_v34  ;;  %4884 = vmatpush3.bf16.msra.mxu1 %v5275_v35 }
 0x562   : > { %4865 = vmatprep.subr.bf16.mxu0 %v5426_v0  ;;  %4885 = vmatprep.subr.bf16.mxu1 %v5426_v0 }
 0x565   : > { %4866 = vmatpush3.bf16.msra.mxu0 %v5276_v36  ;;  %4886 = vmatpush3.bf16.msra.mxu1 %v5277_v37  ;;  %v2813_v36 = vsub.s32 6, %v5547_v7  ;;  %v5306_v7 = vld [vmem:[#allocation2 + $0x5f0] sm:$0xff]  }
 0x566   : > { %4867 = vmatprep.subr.bf16.mxu0 %v5426_v0  ;;  %4887 = vmatprep.subr.bf16.mxu1 %v5426_v0 }
 0x569   : > { %4868 = vmatpush3.bf16.msra.mxu0 %v5278_v38  ;;  %4888 = vmatpush3.bf16.msra.mxu1 %v5279_v39  ;;  %v2814_v39 = vrot.slane %v5550_v10, %v2813_v36  ;;  %v5308_v10 = vld [vmem:[#allocation2 + $0x5e8] sm:$0xff]   ;;  %v5356_v36 = vld [vmem:[#allocation2 + $0x7d8] sm:$0xff]  }
 0x56a   : > { %4869 = vmatprep.subr.bf16.mxu0 %v5426_v0  ;;  %4889 = vmatprep.subr.bf16.mxu1 %v5426_v0 }
 0x56d   : > { %4870 = vmatpush3.bf16.msra.mxu0 %v5280_v40  ;;  %4890 = vmatpush3.bf16.msra.mxu1 %v5281_v41 }
 0x56e   : > { %4871 = vmatprep.subr.bf16.mxu0 %v5426_v0  ;;  %4891 = vmatprep.subr.bf16.mxu1 %v5426_v0 }
 0x571   : > { %4872 = vmatpush3.bf16.msra.mxu0 %v5282_v42  ;;  %4892 = vmatpush3.bf16.msra.mxu1 %v5283_v43 }
 0x572   : > { %4873 = vmatprep.subr.bf16.mxu0 %v5426_v0  ;;  %4893 = vmatprep.subr.bf16.mxu1 %v5426_v0 }
 0x575   : > { %4874 = vmatpush3.bf16.msra.mxu0 %v5284_v44  ;;  %4894 = vmatpush3.bf16.msra.mxu1 %v5285_v45  ;;  %v5304_v44 = vld [vmem:[#allocation2 + $0x5f8] sm:$0xff]  }
 0x576   : > { %4875 = vmatprep.subr.bf16.mxu0 %v5426_v0  ;;  %4895 = vmatprep.subr.bf16.mxu1 %v5426_v0  ;;  %v5305_v45 = vld [vmem:[#allocation2 + $0x6f8] sm:$0xff]  }
 0x579   : > { %4876 = vmatpush3.bf16.msra.mxu0 %v5286_v46  ;;  %4896 = vmatpush3.bf16.msra.mxu1 %v5287_v47  ;;  %v5307_v47 = vld [vmem:[#allocation2 + $0x6f0] sm:$0xff]  }
 0x57a   : > { %4901 = vmatprep.subr.bf16.mxu0 %v5426_v0  ;;  %4921 = vmatprep.subr.bf16.mxu1 %v5426_v0 }
 0x57c   : > { %4878 = vmatmul.mubr.bf16.vlgmr.msra.gmra.mxu0 %v2631_v48  ;;  %4898 = vmatmul.mubr.bf16.vlgmr.msra.gmra.mxu1 %v2631_v48  ;;  %v5309_v48 = vld [vmem:[#allocation2 + $0x6e8] sm:$0xff]  }
 0x57d   : > { %4917 = vmatprep.mubr.msk.bf16.mxu0 %vm5427_vm0, %v5426_v0  ;;  %4937 = vmatprep.mubr.msk.bf16.mxu1 %vm5427_vm0, %v5426_v0 }
 0x57e   : > { %4902 = vmatpush3.bf16.msra.mxu0 %v5288_v49  ;;  %4922 = vmatpush3.bf16.msra.mxu1 %v5289_v50  ;;  %v5310_v49 = vld [vmem:[#allocation2 + $0x5e0] sm:$0xff]  }
 0x57f   : > { %4903 = vmatprep.subr.bf16.mxu0 %v5426_v0  ;;  %4923 = vmatprep.subr.bf16.mxu1 %v5426_v0  ;;  %v5311_v50 = vld [vmem:[#allocation2 + $0x6e0] sm:$0xff]  }
 0x582   : > { %4904 = vmatpush3.bf16.msra.mxu0 %v5290_v51  ;;  %4924 = vmatpush3.bf16.msra.mxu1 %v5291_v52  ;;  %v5312_v51 = vld [vmem:[#allocation2 + $0x5d8] sm:$0xff]  }
 0x583   : > { %4905 = vmatprep.subr.bf16.mxu0 %v5426_v0  ;;  %4925 = vmatprep.subr.bf16.mxu1 %v5426_v0  ;;  %v5313_v52 = vld [vmem:[#allocation2 + $0x6d8] sm:$0xff]  }
 0x586   : > { %4906 = vmatpush3.bf16.msra.mxu0 %v5292_v53  ;;  %4926 = vmatpush3.bf16.msra.mxu1 %v5293_v54  ;;  %v5314_v53 = vld [vmem:[#allocation2 + $0x5d0] sm:$0xff]  }
 0x587   : > { %4907 = vmatprep.subr.bf16.mxu0 %v5426_v0  ;;  %4927 = vmatprep.subr.bf16.mxu1 %v5426_v0  ;;  %v5315_v54 = vld [vmem:[#allocation2 + $0x6d0] sm:$0xff]  }
 0x58a   : > { %4908 = vmatpush3.bf16.msra.mxu0 %v5294_v55  ;;  %4928 = vmatpush3.bf16.msra.mxu1 %v5295_v56  ;;  %v5316_v55 = vld [vmem:[#allocation2 + $0x5c8] sm:$0xff]  }
 0x58b   : > { %4909 = vmatprep.subr.bf16.mxu0 %v5426_v0  ;;  %4929 = vmatprep.subr.bf16.mxu1 %v5426_v0  ;;  %v5317_v56 = vld [vmem:[#allocation2 + $0x6c8] sm:$0xff]  }
 0x58e   : > { %4910 = vmatpush3.bf16.msra.mxu0 %v5296_v57  ;;  %4930 = vmatpush3.bf16.msra.mxu1 %v5297_v58  ;;  %v5318_v57 = vld [vmem:[#allocation2 + $0x5c0] sm:$0xff]  }
 0x58f   : > { %4911 = vmatprep.subr.bf16.mxu0 %v5426_v0  ;;  %4931 = vmatprep.subr.bf16.mxu1 %v5426_v0  ;;  %v5319_v58 = vld [vmem:[#allocation2 + $0x6c0] sm:$0xff]  }
 0x592   : > { %4912 = vmatpush3.bf16.msra.mxu0 %v5298_v59  ;;  %4932 = vmatpush3.bf16.msra.mxu1 %v5299_v60  ;;  %v5320_v59 = vld [vmem:[#allocation2 + $0x678] sm:$0xff]  }
 0x593   : > { %4913 = vmatprep.subr.bf16.mxu0 %v5426_v0  ;;  %4933 = vmatprep.subr.bf16.mxu1 %v5426_v0  ;;  %v5321_v60 = vld [vmem:[#allocation2 + $0x778] sm:$0xff]  }
 0x596   : > { %4914 = vmatpush3.bf16.msra.mxu0 %v5300_v61  ;;  %4934 = vmatpush3.bf16.msra.mxu1 %v5301_v62  ;;  %v5322_v61 = vld [vmem:[#allocation2 + $0x670] sm:$0xff]  }
 0x597   : > { %4915 = vmatprep.subr.bf16.mxu0 %v5426_v0  ;;  %4935 = vmatprep.subr.bf16.mxu1 %v5426_v0  ;;  %v5323_v62 = vld [vmem:[#allocation2 + $0x770] sm:$0xff]  }
 0x59a   : > { %4916 = vmatpush3.bf16.msra.mxu0 %v5302_v63  ;;  %4936 = vmatpush3.bf16.msra.mxu1 %v5303_v1  ;;  %v5324_v63 = vld [vmem:[#allocation2 + $0x668] sm:$0xff]  }
 0x59b   : > { %4941 = vmatprep.subr.bf16.mxu0 %v5426_v0  ;;  %4961 = vmatprep.subr.bf16.mxu1 %v5426_v0  ;;  %v5325_v1 = vld [vmem:[#allocation2 + $0x768] sm:$0xff]  }
 0x5fc   : > { %v2328_v2 = vpop.f32.mrf.mxu0  ;;  %v2416_v3 = vpop.f32.mrf.mxu1 }
 0x5fe   : > { %v4799_v4 = vpop.f32.mrf.mxu0  ;;  %v4819_v5 = vpop.f32.mrf.mxu1 }
 0x5ff   : > { %v5328_v4 = vld [vmem:[#allocation2 + $0x658] sm:$0xff]  }
 0x600   : > { %v2331_v6 = vpop.f32.mrf.mxu0  ;;  %v2419_v8 = vpop.f32.mrf.mxu1  ;;  %v5329_v5 = vld [vmem:[#allocation2 + $0x758] sm:$0xff]  }
 0x601   : > { %v5330_v6 = vld [vmem:[#allocation2 + $0x650] sm:$0xff]  }
 0x602   : > { %v4800_v9 = vpop.f32.mrf.mxu0  ;;  %v4820_v11 = vpop.f32.mrf.mxu1  ;;  %v5331_v8 = vld [vmem:[#allocation2 + $0x750] sm:$0xff]  }
 0x603   : > { %v5332_v9 = vld [vmem:[#allocation2 + $0x648] sm:$0xff]  }
 0x604   : > { %v5333_v11 = vld [vmem:[#allocation2 + $0x748] sm:$0xff]  }
 0x61c   : > { %v2504_v12 = vpop.f32.mrf.mxu0  ;;  %v2592_v13 = vpop.f32.mrf.mxu1 }
 0x61d   : > { %v2593_v21 = vadd.f32 %v2592_v13, %v2416_v3  ;;  %v2505_v37 = vadd.f32 %v2504_v12, %v2328_v2  ;;  %v5326_v2 = vld [vmem:[#allocation2 + $0x660] sm:$0xff]  }
 0x61e   : > { %v4839_v14 = vpop.f32.mrf.mxu0  ;;  %v4859_v15 = vpop.f32.mrf.mxu1  ;;  %v5327_v3 = vld [vmem:[#allocation2 + $0x760] sm:$0xff]  }
 0x61f   : > { %v5334_v12 = vld [vmem:[#allocation2 + $0x640] sm:$0xff]   ;;  %v5336_v14 = vld [vmem:[#allocation2 + $0x6b8] sm:$0xff]  }
 0x620   : > { %v2507_v16 = vpop.f32.mrf.mxu0  ;;  %v2595_v17 = vpop.f32.mrf.mxu1  ;;  %v5335_v13 = vld [vmem:[#allocation2 + $0x740] sm:$0xff]   ;;  %v5337_v15 = vld [vmem:[#allocation2 + $0x7b8] sm:$0xff]  }
 0x621   : > { %v5338_v17 = vld [vmem:[#allocation2 + $0x6b0] sm:$0xff]  }
 0x622   : > { %v4840_v18 = vpop.f32.mrf.mxu0  ;;  %v4860_v19 = vpop.f32.mrf.mxu1 }
 0x623   : > { %v5339_v18 = vld [vmem:[#allocation2 + $0x7b0] sm:$0xff]   ;;  %v5340_v19 = vld [vmem:[#allocation2 + $0x6a8] sm:$0xff]  }
 0x63c   : > { %v2715_v23 = vpop.f32.mrf.mxu0  ;;  %v2803_v24 = vpop.f32.mrf.mxu1 }
 0x63d   : > { %v2810_v25 = vadd.f32 %v2803_v24, %v2593_v21  ;;  %v2809_v38 = vadd.f32 %v2715_v23, %v2505_v37  ;;  %v5342_v21 = vld [vmem:[#allocation2 + $0x6a0] sm:$0xff]   ;;  %v5344_v23 = vld [vmem:[#allocation2 + $0x698] sm:$0xff]   ;;  %v5357_v37 = vld [vmem:[#allocation2 + $0x7d0] sm:$0xff]  }
 0x63e   : > { %v4879_v26 = vpop.f32.mrf.mxu0  ;;  %v4899_v27 = vpop.f32.mrf.mxu1  ;;  %v5345_v24 = vld [vmem:[#allocation2 + $0x798] sm:$0xff]  }
 0x63f   : > { %v2820_v28 = vadd.f32 %v2819_v22, %v2810_v25  ;;  %v2815_v40 = vadd.f32 %v2814_v39, %v2809_v38  ;;  %v5343_v22 = vld [vmem:[#allocation2 + $0x7a0] sm:$0xff]   ;;  %v5346_v25 = vld [vmem:[#allocation2 + $0x690] sm:$0xff]   ;;  %v5348_v27 = vld [vmem:[#allocation2 + $0x688] sm:$0xff]  }
 0x640   : > { %v2718_v29 = vpop.f32.mrf.mxu0  ;;  %v2806_v30 = vpop.f32.mrf.mxu1  ;;  %v5347_v26 = vld [vmem:[#allocation2 + $0x790] sm:$0xff]   ;;  %v5358_v38 = vld [vmem:[#allocation2 + $0x7c8] sm:$0xff]  }
 0x641   : > { %v4056_v31 = vmul.f32 -1.442695, %v2820_v28  ;;  %v5349_v28 = vld [vmem:[#allocation2 + $0x788] sm:$0xff]   ;;  %v5350_v29 = vld [vmem:[#allocation2 + $0x680] sm:$0xff]  }
 0x642   : > { %v4880_v32 = vpop.f32.mrf.mxu0  ;;  %v4900_v33 = vpop.f32.mrf.mxu1  ;;  %v5351_v30 = vld [vmem:[#allocation2 + $0x780] sm:$0xff]  }
 0x643   : > { %5376 = vpow2.f32 %v4056_v31  ;;  %v5352_v32 = vld [vmem:[#allocation2 + $0x7f8] sm:$0xff]   ;;  %v5353_v33 = vld [vmem:[#allocation2 + $0x7f0] sm:$0xff]  }
 0x650   : > { %v5377_v34 = vpop.eup %5376 }
 0x651   : > { %v2824_v35 = vadd.f32 1.0, %v5377_v34  ;;  %v5354_v34 = vld [vmem:[#allocation2 + $0x7e8] sm:$0xff]  }
 0x653   : > { %5378 = vrcp.f32 %v2824_v35  ;;  %v5355_v35 = vld [vmem:[#allocation2 + $0x7e0] sm:$0xff]  }
 0x660   : > { %v5379_v41 = vpop.eup %5378 }
 0x661   : > { %v2827_v42 = vmul.f32 %v5379_v41, %v2815_v40 }
 0x663   : > { %v5791_v43 = vpack.c.bf16 %v2827_v42, %v2827_v42 }
 0x665   : > { %v5794_v46 = vshrl.u32 %v5791_v43, 16  ;;  %v3282_v16 = vrot.slane %v5791_v43, 1 }
 0x667   : > { %4918 = vmatmul.mubr.bf16.vlgmr.msra.gmra.mxu0 %v5794_v46  ;;  %4938 = vmatmul.mubr.bf16.vlgmr.msra.gmra.mxu1 %v5794_v46  ;;  %v3494_v31 = vrot.slane %v5794_v46, 1 }
 0x668   : > { %4942 = vmatpush3.bf16.msra.mxu0 %v5304_v44  ;;  %4962 = vmatpush3.bf16.msra.mxu1 %v5305_v45 }
 0x669   : > { %4943 = vmatprep.subr.bf16.mxu0 %v5426_v0  ;;  %4963 = vmatprep.subr.bf16.mxu1 %v5426_v0 }
 0x66a   : > { %4957 = vmatprep.mubr.msk.bf16.mxu0 %vm5427_vm0, %v5426_v0  ;;  %4977 = vmatprep.mubr.msk.bf16.mxu1 %vm5427_vm0, %v5426_v0 }
 0x66c   : > { %4944 = vmatpush3.bf16.msra.mxu0 %v5306_v7  ;;  %4964 = vmatpush3.bf16.msra.mxu1 %v5307_v47 }
 0x66d   : > { %4945 = vmatprep.subr.bf16.mxu0 %v5426_v0  ;;  %4965 = vmatprep.subr.bf16.mxu1 %v5426_v0 }
 0x670   : > { %4946 = vmatpush3.bf16.msra.mxu0 %v5308_v10  ;;  %4966 = vmatpush3.bf16.msra.mxu1 %v5309_v48 }
 0x671   : > { %4947 = vmatprep.subr.bf16.mxu0 %v5426_v0  ;;  %4967 = vmatprep.subr.bf16.mxu1 %v5426_v0 }
 0x674   : > { %4948 = vmatpush3.bf16.msra.mxu0 %v5310_v49  ;;  %4968 = vmatpush3.bf16.msra.mxu1 %v5311_v50 }
 0x675   : > { %4949 = vmatprep.subr.bf16.mxu0 %v5426_v0  ;;  %4969 = vmatprep.subr.bf16.mxu1 %v5426_v0 }
 0x678   : > { %4950 = vmatpush3.bf16.msra.mxu0 %v5312_v51  ;;  %4970 = vmatpush3.bf16.msra.mxu1 %v5313_v52 }
 0x679   : > { %4951 = vmatprep.subr.bf16.mxu0 %v5426_v0  ;;  %4971 = vmatprep.subr.bf16.mxu1 %v5426_v0 }
 0x67c   : > { %4952 = vmatpush3.bf16.msra.mxu0 %v5314_v53  ;;  %4972 = vmatpush3.bf16.msra.mxu1 %v5315_v54 }
 0x67d   : > { %4953 = vmatprep.subr.bf16.mxu0 %v5426_v0  ;;  %4973 = vmatprep.subr.bf16.mxu1 %v5426_v0 }
 0x680   : > { %4954 = vmatpush3.bf16.msra.mxu0 %v5316_v55  ;;  %4974 = vmatpush3.bf16.msra.mxu1 %v5317_v56 }
 0x681   : > { %4955 = vmatprep.subr.bf16.mxu0 %v5426_v0  ;;  %4975 = vmatprep.subr.bf16.mxu1 %v5426_v0 }
 0x684   : > { %4956 = vmatpush3.bf16.msra.mxu0 %v5318_v57  ;;  %4976 = vmatpush3.bf16.msra.mxu1 %v5319_v58 }
 0x685   : > { %4981 = vmatprep.subr.bf16.mxu0 %v5426_v0  ;;  %5001 = vmatprep.subr.bf16.mxu1 %v5426_v0 }
 0x687   : > { %4958 = vmatmul.mubr.bf16.vlgmr.msra.gmra.mxu0 %v5791_v43  ;;  %4978 = vmatmul.mubr.bf16.vlgmr.msra.gmra.mxu1 %v5791_v43  ;;  %v5359_v43 = vld [vmem:[#allocation2 + $0x7c0] sm:$0xff]  }
 0x688   : > { %4982 = vmatpush3.bf16.msra.mxu0 %v5320_v59  ;;  %5002 = vmatpush3.bf16.msra.mxu1 %v5321_v60 }
 0x689   : > { %4983 = vmatprep.subr.bf16.mxu0 %v5426_v0  ;;  %5003 = vmatprep.subr.bf16.mxu1 %v5426_v0 }
 0x68a   : > { %4997 = vmatprep.mubr.msk.bf16.mxu0 %vm5427_vm0, %v5426_v0  ;;  %5017 = vmatprep.mubr.msk.bf16.mxu1 %vm5427_vm0, %v5426_v0 }
 0x68c   : > { %4984 = vmatpush3.bf16.msra.mxu0 %v5322_v61  ;;  %5004 = vmatpush3.bf16.msra.mxu1 %v5323_v62  ;;  %v5384_v62 = vld [vmem:[#allocation2 + $0x800] sm:$0xff]  }
 0x68d   : > { %4985 = vmatprep.subr.bf16.mxu0 %v5426_v0  ;;  %5005 = vmatprep.subr.bf16.mxu1 %v5426_v0 }
 0x690   : > { %4986 = vmatpush3.bf16.msra.mxu0 %v5324_v63  ;;  %5006 = vmatpush3.bf16.msra.mxu1 %v5325_v1  ;;  %v4136_v63 = vunpack.c.h.bf16 %v5384_v62 }
 0x691   : > { %4987 = vmatprep.subr.bf16.mxu0 %v5426_v0  ;;  %5007 = vmatprep.subr.bf16.mxu1 %v5426_v0 }
 0x694   : > { %4988 = vmatpush3.bf16.msra.mxu0 %v5326_v2  ;;  %5008 = vmatpush3.bf16.msra.mxu1 %v5327_v3  ;;  %v3676_v3 = vrot.slane %v4136_v63, 1 }
 0x695   : > { %4989 = vmatprep.subr.bf16.mxu0 %v5426_v0  ;;  %5009 = vmatprep.subr.bf16.mxu1 %v5426_v0 }
 0x698   : > { %4990 = vmatpush3.bf16.msra.mxu0 %v5328_v4  ;;  %5010 = vmatpush3.bf16.msra.mxu1 %v5329_v5 }
 0x699   : > { %4991 = vmatprep.subr.bf16.mxu0 %v5426_v0  ;;  %5011 = vmatprep.subr.bf16.mxu1 %v5426_v0 }
 0x69c   : > { %4992 = vmatpush3.bf16.msra.mxu0 %v5330_v6  ;;  %5012 = vmatpush3.bf16.msra.mxu1 %v5331_v8 }
 0x69d   : > { %4993 = vmatprep.subr.bf16.mxu0 %v5426_v0  ;;  %5013 = vmatprep.subr.bf16.mxu1 %v5426_v0 }
 0x6a0   : > { %4994 = vmatpush3.bf16.msra.mxu0 %v5332_v9  ;;  %5014 = vmatpush3.bf16.msra.mxu1 %v5333_v11 }
 0x6a1   : > { %4995 = vmatprep.subr.bf16.mxu0 %v5426_v0  ;;  %5015 = vmatprep.subr.bf16.mxu1 %v5426_v0 }
 0x6a4   : > { %4996 = vmatpush3.bf16.msra.mxu0 %v5334_v12  ;;  %5016 = vmatpush3.bf16.msra.mxu1 %v5335_v13 }
 0x6a5   : > { %5021 = vmatprep.subr.bf16.mxu0 %v5426_v0  ;;  %5041 = vmatprep.subr.bf16.mxu1 %v5426_v0 }
 0x6a7   : > { %4998 = vmatmul.mubr.bf16.vlgmr.msra.gmra.mxu0 %v3282_v16  ;;  %5018 = vmatmul.mubr.bf16.vlgmr.msra.gmra.mxu1 %v3282_v16 }
 0x6a8   : > { %5022 = vmatpush3.bf16.msra.mxu0 %v5336_v14  ;;  %5042 = vmatpush3.bf16.msra.mxu1 %v5337_v15 }
 0x6a9   : > { %5023 = vmatprep.subr.bf16.mxu0 %v5426_v0  ;;  %5043 = vmatprep.subr.bf16.mxu1 %v5426_v0 }
 0x6aa   : > { %5037 = vmatprep.mubr.msk.bf16.mxu0 %vm5427_vm0, %v5426_v0  ;;  %5057 = vmatprep.mubr.msk.bf16.mxu1 %vm5427_vm0, %v5426_v0 }
 0x6ac   : > { %5024 = vmatpush3.bf16.msra.mxu0 %v5338_v17  ;;  %5044 = vmatpush3.bf16.msra.mxu1 %v5339_v18 }
 0x6ad   : > { %5025 = vmatprep.subr.bf16.mxu0 %v5426_v0  ;;  %5045 = vmatprep.subr.bf16.mxu1 %v5426_v0 }
 0x6b0   : > { %5026 = vmatpush3.bf16.msra.mxu0 %v5340_v19  ;;  %5046 = vmatpush3.bf16.msra.mxu1 %v5341_v20 }
 0x6b1   : > { %5027 = vmatprep.subr.bf16.mxu0 %v5426_v0  ;;  %5047 = vmatprep.subr.bf16.mxu1 %v5426_v0 }
 0x6b4   : > { %5028 = vmatpush3.bf16.msra.mxu0 %v5342_v21  ;;  %5048 = vmatpush3.bf16.msra.mxu1 %v5343_v22 }
 0x6b5   : > { %5029 = vmatprep.subr.bf16.mxu0 %v5426_v0  ;;  %5049 = vmatprep.subr.bf16.mxu1 %v5426_v0 }
 0x6b8   : > { %5030 = vmatpush3.bf16.msra.mxu0 %v5344_v23  ;;  %5050 = vmatpush3.bf16.msra.mxu1 %v5345_v24 }
 0x6b9   : > { %5031 = vmatprep.subr.bf16.mxu0 %v5426_v0  ;;  %5051 = vmatprep.subr.bf16.mxu1 %v5426_v0 }
 0x6bc   : > { %5032 = vmatpush3.bf16.msra.mxu0 %v5346_v25  ;;  %5052 = vmatpush3.bf16.msra.mxu1 %v5347_v26  ;;  %v3751_v25 = vrot.slane %v4136_v63, 2 }
 0x6bd   : > { %5033 = vmatprep.subr.bf16.mxu0 %v5426_v0  ;;  %5053 = vmatprep.subr.bf16.mxu1 %v5426_v0 }
 0x6c0   : > { %5034 = vmatpush3.bf16.msra.mxu0 %v5348_v27  ;;  %5054 = vmatpush3.bf16.msra.mxu1 %v5349_v28 }
 0x6c1   : > { %5035 = vmatprep.subr.bf16.mxu0 %v5426_v0  ;;  %5055 = vmatprep.subr.bf16.mxu1 %v5426_v0 }
 0x6c4   : > { %5036 = vmatpush3.bf16.msra.mxu0 %v5350_v29  ;;  %5056 = vmatpush3.bf16.msra.mxu1 %v5351_v30 }
 0x6c5   : > { %5061 = vmatprep.subr.bf16.mxu0 %v5426_v0 }
 0x6c7   : > { %5038 = vmatmul.mubr.bf16.vlgmr.msra.gmra.mxu0 %v3494_v31  ;;  %5058 = vmatmul.mubr.bf16.vlgmr.msra.gmra.mxu1 %v3494_v31 }
 0x6c8   : > { %5077 = vmatprep.mubr.msk.bf16.mxu0 %vm5427_vm0, %v5426_v0  ;;  %5062 = vmatpush3.bf16.msra.mxu0 %v5352_v32 }
 0x6c9   : > { %5063 = vmatprep.subr.bf16.mxu0 %v5426_v0 }
 0x6cc   : > { %5064 = vmatpush3.bf16.msra.mxu0 %v5353_v33 }
 0x6cd   : > { %5065 = vmatprep.subr.bf16.mxu0 %v5426_v0 }
 0x6d0   : > { %5066 = vmatpush3.bf16.msra.mxu0 %v5354_v34 }
 0x6d1   : > { %5067 = vmatprep.subr.bf16.mxu0 %v5426_v0 }
 0x6d4   : > { %5068 = vmatpush3.bf16.msra.mxu0 %v5355_v35 }
 0x6d5   : > { %5069 = vmatprep.subr.bf16.mxu0 %v5426_v0 }
 0x6d8   : > { %5070 = vmatpush3.bf16.msra.mxu0 %v5356_v36 }
 0x6d9   : > { %5071 = vmatprep.subr.bf16.mxu0 %v5426_v0 }
 0x6dc   : > { %5072 = vmatpush3.bf16.msra.mxu0 %v5357_v37 }
 0x6dd   : > { %5073 = vmatprep.subr.bf16.mxu0 %v5426_v0 }
 0x6e0   : > { %5074 = vmatpush3.bf16.msra.mxu0 %v5358_v38 }
 0x6e1   : > { %5075 = vmatprep.subr.bf16.mxu0 %v5426_v0 }
 0x6e4   : > { %5076 = vmatpush3.bf16.msra.mxu0 %v5359_v43 }
 0x727   : > { %v2979_v39 = vpop.f32.mrf.mxu0  ;;  %v3067_v40 = vpop.f32.mrf.mxu1 }
 0x729   : > { %v4919_v41 = vpop.f32.mrf.mxu0  ;;  %v4939_v42 = vpop.f32.mrf.mxu1 }
 0x72b   : > { %v2982_v44 = vpop.f32.mrf.mxu0  ;;  %v3070_v45 = vpop.f32.mrf.mxu1 }
 0x72d   : > { %v4920_v46 = vpop.f32.mrf.mxu0  ;;  %v4940_v7 = vpop.f32.mrf.mxu1 }
 0x747   : > { %v3155_v47 = vpop.f32.mrf.mxu0  ;;  %v3243_v10 = vpop.f32.mrf.mxu1 }
 0x748   : > { %v3156_v48 = vadd.f32 %v3155_v47, %v2979_v39  ;;  %v3244_v1 = vadd.f32 %v3243_v10, %v3067_v40 }
 0x749   : > { %v4959_v49 = vpop.f32.mrf.mxu0  ;;  %v4979_v50 = vpop.f32.mrf.mxu1 }
 0x74b   : > { %v3158_v51 = vpop.f32.mrf.mxu0  ;;  %v3246_v52 = vpop.f32.mrf.mxu1 }
 0x74d   : > { %v4960_v53 = vpop.f32.mrf.mxu0  ;;  %v4980_v54 = vpop.f32.mrf.mxu1 }
 0x767   : > { %v3366_v55 = vpop.f32.mrf.mxu0  ;;  %v3454_v56 = vpop.f32.mrf.mxu1 }
 0x768   : > { %v3461_v2 = vadd.f32 %v3454_v56, %v3244_v1  ;;  %v3460_v19 = vadd.f32 %v3366_v55, %v3156_v48 }
 0x769   : > { %v4999_v57 = vpop.f32.mrf.mxu0  ;;  %v5019_v58 = vpop.f32.mrf.mxu1 }
 0x76b   : > { %v3369_v59 = vpop.f32.mrf.mxu0  ;;  %v3457_v0 = vpop.f32.mrf.mxu1 }
 0x76d   : > { %v5000_v60 = vpop.f32.mrf.mxu0  ;;  %v5020_v61 = vpop.f32.mrf.mxu1 }
 0x787   : > { %v3578_v4 = vpop.f32.mrf.mxu0  ;;  %v3666_v5 = vpop.f32.mrf.mxu1 }
 0x788   : > { %v3673_v6 = vadd.f32 %v3666_v5, %v3461_v2  ;;  %v3672_v20 = vadd.f32 %v3578_v4, %v3460_v19 }
 0x789   : > { %v5039_v8 = vpop.f32.mrf.mxu0  ;;  %v5059_v9 = vpop.f32.mrf.mxu1 }
 0x78a   : > { %v3678_v11 = vadd.f32 %v3676_v3, %v3673_v6  ;;  %v3674_v21 = vadd.f32 %v4136_v63, %v3672_v20 }
 0x78b   : > { %v3581_v12 = vpop.f32.mrf.mxu0  ;;  %v3669_v13 = vpop.f32.mrf.mxu1 }
 0x78c   : > { %v4121_v14 = vmul.f32 -1.442695, %v3678_v11 }
 0x78d   : > { %v5040_v15 = vpop.f32.mrf.mxu0  ;;  %v5060_v16 = vpop.f32.mrf.mxu1 }
 0x78e   : > { %5380 = vpow2.f32 %v4121_v14 }
 0x79b   : > { %v5381_v17 = vpop.eup %5380 }
 0x79c   : > { %v3682_v18 = vadd.f32 1.0, %v5381_v17 }
 0x79e   : > { %5382 = vrcp.f32 %v3682_v18 }
 0x7ab   : > { %v5383_v22 = vpop.eup %5382 }
 0x7ac   : > { %v3685_v23 = vmul.f32 %v5383_v22, %v3674_v21 }
 0x7ae   : > { %v3686_v24 = vpack.c.bf16 %v3685_v23, %v3685_v23 }
 0x7b0   : > { %5078 = vmatmul.mubr.bf16.vlgmr.msra.gmra.mxu0 %v3686_v24 }
 0x870   : > { %v3787_v26 = vpop.f32.mrf.mxu0 }
 0x871   : > { %v3788_v27 = vadd.f32 %v3787_v26, %v3751_v25 }
 0x872   : > { %v5079_v28 = vpop.f32.mrf.mxu0 }
 0x873   : > { %3793 = vst [vmem:[%s154_s25] sm:$0x1] %v3788_v27 }
 0x874   : > { %v3790_v29 = vpop.f32.mrf.mxu0 }
 0x876   : > { %v5080_v30 = vpop.f32.mrf.mxu0 }
 0x877 PF: > { %s13_s9 = sadd.s32 1, %s5421_s9  }
 0x878   : > { %p10_p1 = scmp.ge.s32.totalorder %s13_s9, 4  }
 0x87a   :  { %12 = sbr.rel (!%p10_p1) target bundleno = 1 (0x1), region = 63 }
 0x87f   :  { %3811 = vsyncpa [#allocation3], 1 }
 0x880   :  { %3813 = vsyncpa [#allocation3 + $0x1], 1 }

</bundles_post_ra>
